<compile_context>
chip_gen: v7x
topology: tpu7x:2x2x1
jax: 0.10.0
libtpu: 0.0.40
codegen_flags: <defaults>
</compile_context>

<pallas_src>
import jax
import jax.numpy as jnp
from jax import lax
from jax.experimental import pallas as pl
from jax.experimental.pallas import tpu as pltpu


def _nearest_upsample_matrix(TD, H, W):
    """0/1 operator U of shape (TD*H*W, 8*TD*H*W).

    Row index s flattens a (TD, H, W) tile row-major; column index o flattens
    the (2*TD, 2*H, 2*W) nearest-upsampled tile row-major. U[s, o] == 1 iff
    output voxel o is a copy of input voxel s (exactly one 1 per column).
    """
    S = TD * H * W
    s = jnp.arange(S)
    st = s // (H * W)
    sh = (s // W) % H
    sw = s % W
    o = jnp.arange(8 * S)
    ot = o // (4 * H * W)
    oh = (o // (2 * W)) % (2 * H)
    ow = o % (2 * W)
    u = ((ot // 2)[None, :] == st[:, None]) \
        & ((oh // 2)[None, :] == sh[:, None]) \
        & ((ow // 2)[None, :] == sw[:, None])
    return u.astype(jnp.float32)


def _pick_depth_tile(D, HW, max_u_bytes=8 * 2**20):
    """Depth tile TD: divides D, keeps blocks lane-aligned (TD*HW % 128 == 0),
    keeps the upsample operator small, and (when possible) leaves >= 2 grid
    steps along D for pipelining / 2-TC sharding. Falls back to TD = D
    (full-extent blocks are always legal)."""
    candidates = [td for td in range(1, D + 1)
                  if D % td == 0
                  and (td * HW) % 128 == 0
                  and 16 * (td * HW) ** 2 <= max_u_bytes]
    multi_step = [td for td in candidates if D // td >= 2]
    if multi_step:
        return max(multi_step)
    if candidates:
        return min(candidates)
    return D


def _upblock2_kernel(x_ref, w_ref, b_ref, u_ref, o_ref):
    # x_ref: (1, C, S)      bf16   flattened (TD, H, W) input slab
    # w_ref: (OC, C)        bf16   1x1x1 conv weight
    # b_ref: (OC, 1)        f32    bias
    # u_ref: (S, 8*S)       bf16   0/1 nearest-upsample operator
    # o_ref: (1, OC, 8*S)   f32    flattened (2*TD, 2*H, 2*W) output slab
    x = x_ref[0]                                               # (C, S)
    # Upsample first (exact: each column of U has exactly one 1), then conv.
    xup = jnp.dot(x, u_ref[...],
                  preferred_element_type=jnp.float32)          # (C, 8S)
    y = jnp.dot(w_ref[...], xup.astype(jnp.bfloat16),
                preferred_element_type=jnp.float32)            # (OC, 8S)
    y = y + b_ref[...]                                         # bias (f32)
    o_ref[0] = y.astype(o_ref.dtype)


def up_block2_forward(x_ncdhw, weight_oidhw, bias):
    """UpBlock2.forward == Upsample(scale=2, 'nearest')(Conv3d(k=1, s=1)(x)).

    x_ncdhw:      (N, C, D, H, W)      float32
    weight_oidhw: (OC, C, 1, 1, 1)     float32 (PyTorch layout)
    bias:         (OC,)                float32
    returns:      (N, OC, 2D, 2H, 2W)  float32
    """
    N, C, D, H, W = x_ncdhw.shape
    OC = weight_oidhw.shape[0]
    HW = H * W
    TD = _pick_depth_tile(D, HW)
    S = TD * HW
    n_d = D // TD

    # Free reshapes (contiguous); bf16 at the kernel boundary, f32 accumulate.
    x_flat = x_ncdhw.reshape(N, C, D * HW).astype(jnp.bfloat16)
    w2 = weight_oidhw.reshape(OC, C).astype(jnp.bfloat16)
    b2 = bias.reshape(OC, 1).astype(jnp.float32)
    u = _nearest_upsample_matrix(TD, H, W).astype(jnp.bfloat16)   # (S, 8S)

    gsteps = N * n_d
    flops = (2 * C * S * 8 * S + 2 * OC * C * 8 * S) * gsteps
    bytes_accessed = (x_flat.size * 2 + w2.size * 2 + b2.size * 4
                      + u.size * 2 + N * OC * 8 * D * HW * 4)

    out = pl.pallas_call(
        _upblock2_kernel,
        out_shape=jax.ShapeDtypeStruct((N, OC, 8 * D * HW), jnp.float32),
        grid_spec=pltpu.PrefetchScalarGridSpec(
            num_scalar_prefetch=0,
            grid=(N, n_d),
            in_specs=[
                pl.BlockSpec((1, C, S), lambda n, d: (n, 0, d)),
                pl.BlockSpec((OC, C), lambda n, d: (0, 0)),
                pl.BlockSpec((OC, 1), lambda n, d: (0, 0)),
                pl.BlockSpec((S, 8 * S), lambda n, d: (0, 0)),
            ],
            out_specs=pl.BlockSpec((1, OC, 8 * S), lambda n, d: (n, 0, d)),
        ),
        compiler_params=pltpu.CompilerParams(
            dimension_semantics=("parallel", "parallel"),
            vmem_limit_bytes=32 * 1024 * 1024,
        ),
        cost_estimate=pl.CostEstimate(
            flops=flops, transcendentals=0, bytes_accessed=bytes_accessed),
    )(x_flat, w2, b2, u)

    # Free reshape: the flattened lane axis is already (2D, 2H, 2W) row-major,
    # so no transpose / relayout is needed to get back to NCDHW.
    return out.reshape(N, OC, 2 * D, 2 * H, 2 * W)


def _reference_upblock2(x_ncdhw, weight_oidhw, bias):
    """Same math at the same precision policy: bf16 inputs, f32 accumulation."""
    xb = x_ncdhw.astype(jnp.bfloat16)
    wb = weight_oidhw.astype(jnp.bfloat16)
    y = lax.conv_general_dilated(
        xb, wb,
        window_strides=(1, 1, 1),
        padding=((0, 0), (0, 0), (0, 0)),
        dimension_numbers=("NCDHW", "OIDHW", "NCDHW"),
        preferred_element_type=jnp.float32,
    )
    y = y + bias.reshape(1, -1, 1, 1, 1).astype(jnp.float32)
    y = jnp.repeat(y, 2, axis=2)
    y = jnp.repeat(y, 2, axis=3)
    y = jnp.repeat(y, 2, axis=4)
    return y


if __name__ == "__main__":
    key = jax.random.PRNGKey(0)
    k_x, k_w, k_b = jax.random.split(key, 3)

    # Small shapes consistent with UpBlock2(in_channels=4, out_channels=32).
    N, C, D, H, W = 2, 4, 8, 8, 8
    OC = 32

    x = jax.random.normal(k_x, (N, C, D, H, W), dtype=jnp.float32)
    fan_in = C * 1 * 1 * 1
    bound = 1.0 / (fan_in ** 0.5)
    weight = jax.random.uniform(k_w, (OC, C, 1, 1, 1),
                                minval=-bound, maxval=bound,
                                dtype=jnp.float32)
    bias = jax.random.uniform(k_b, (OC,), minval=-bound, maxval=bound,
                              dtype=jnp.float32)

    y = up_block2_forward(x, weight, bias)
    y = jax.block_until_ready(y)

    y_ref = _reference_upblock2(x, weight, bias)
    assert y.shape == (N, OC, 2 * D, 2 * H, 2 * W), y.shape
    max_err = float(jnp.max(jnp.abs(y - y_ref)))
    assert jnp.allclose(y, y_ref, atol=1e-3, rtol=1e-3), max_err

    print("KERNEL_OK")
</pallas_src>

<mosaic_0001>
module attributes {stable_mosaic.version = 11 : i64} {
  func.func @_upblock2_kernel(%arg0: i32, %arg1: i32, %arg2: memref<1x4x256xbf16, #tpu.memory_space<vmem>>, %arg3: memref<32x4xbf16, #tpu.memory_space<vmem>>, %arg4: memref<32x1xf32, #tpu.memory_space<vmem>>, %arg5: memref<256x2048xbf16, #tpu.memory_space<vmem>>, %arg6: memref<1x32x2048xf32, #tpu.memory_space<vmem>>) attributes {dimension_semantics = [#tpu.dimension_semantics<parallel>, #tpu.dimension_semantics<parallel>], iteration_bounds = array<i64: 2, 2>, scalar_prefetch = 0 : i64, scratch_operands = 0 : i64, tpu.core_type = #tpu.core_type<tc>, window_params = [{transform_indices = @transform_0, window_bounds = array<i64: 1, 4, 256>}, {pipeline_mode = #tpu.pipeline_mode<synchronous>, transform_indices = @transform_1, window_bounds = array<i64: 32, 4>}, {pipeline_mode = #tpu.pipeline_mode<synchronous>, transform_indices = @transform_2, window_bounds = array<i64: 32, 1>}, {pipeline_mode = #tpu.pipeline_mode<synchronous>, transform_indices = @transform_3, window_bounds = array<i64: 256, 2048>}, {transform_indices = @transform_4, window_bounds = array<i64: 1, 32, 2048>}]} {
    %c0 = arith.constant 0 : index
    %c0_0 = arith.constant 0 : index
    %c0_1 = arith.constant 0 : index
    %0 = vector.load %arg2[%c0, %c0_0, %c0_1] : memref<1x4x256xbf16, #tpu.memory_space<vmem>>, vector<1x4x256xbf16>
    %1 = vector.shape_cast %0 : vector<1x4x256xbf16> to vector<4x256xbf16>
    %c0_2 = arith.constant 0 : index
    %c0_3 = arith.constant 0 : index
    %2 = vector.load %arg5[%c0_2, %c0_3] : memref<256x2048xbf16, #tpu.memory_space<vmem>>, vector<256x2048xbf16>
    %cst = arith.constant dense<0.000000e+00> : vector<4x2048xf32>
    %3 = tpu.matmul %1, %2, %cst {dimension_numbers = #tpu.dot_dimension_numbers<[1], [0], [0], [1], [0, 0, 1, 1], [], []>} : vector<4x256xbf16>, vector<256x2048xbf16>, vector<4x2048xf32> -> vector<4x2048xf32>
    %c0_4 = arith.constant 0 : index
    %c0_5 = arith.constant 0 : index
    %4 = vector.load %arg3[%c0_4, %c0_5] : memref<32x4xbf16, #tpu.memory_space<vmem>>, vector<32x4xbf16>
    %5 = arith.truncf %3 : vector<4x2048xf32> to vector<4x2048xbf16>
    %cst_6 = arith.constant dense<0.000000e+00> : vector<32x2048xf32>
    %6 = tpu.matmul %4, %5, %cst_6 {dimension_numbers = #tpu.dot_dimension_numbers<[1], [0], [0], [1], [0, 0, 1, 1], [], []>} : vector<32x4xbf16>, vector<4x2048xbf16>, vector<32x2048xf32> -> vector<32x2048xf32>
    %c0_7 = arith.constant 0 : index
    %c0_8 = arith.constant 0 : index
    %7 = vector.load %arg4[%c0_7, %c0_8] : memref<32x1xf32, #tpu.memory_space<vmem>>, vector<32x1xf32>
    %8 = vector.broadcast %7 : vector<32x1xf32> to vector<32x2048xf32>
    %9 = arith.addf %6, %8 : vector<32x2048xf32>
    %c0_9 = arith.constant 0 : index
    %c0_10 = arith.constant 0 : index
    %c0_11 = arith.constant 0 : index
    %10 = vector.load %arg6[%c0_9, %c0_10, %c0_11] : memref<1x32x2048xf32, #tpu.memory_space<vmem>>, vector<1x32x2048xf32>
    %11 = vector.shape_cast %10 : vector<1x32x2048xf32> to vector<32x2048xf32>
    %12 = vector.shape_cast %9 : vector<32x2048xf32> to vector<1x32x2048xf32>
    tpu.vector_store %arg6[%c0_9, %c0_10, %c0_11], %12 {strides = array<i32>} : memref<1x32x2048xf32, #tpu.memory_space<vmem>>, vector<1x32x2048xf32>,
    return
  }
  func.func @transform_0(%arg0: i32, %arg1: i32) -> (i32, i32, i32) {
    %c0_i32 = arith.constant 0 : i32
    %c0_i32_0 = arith.constant 0 : i32
    return %arg0, %c0_i32, %arg1 : i32, i32, i32
  }
  func.func @transform_1(%arg0: i32, %arg1: i32) -> (i32, i32) {
    %c0_i32 = arith.constant 0 : i32
    %c0_i32_0 = arith.constant 0 : i32
    %c0_i32_1 = arith.constant 0 : i32
    return %c0_i32, %c0_i32_0 : i32, i32
  }
  func.func @transform_2(%arg0: i32, %arg1: i32) -> (i32, i32) {
    %c0_i32 = arith.constant 0 : i32
    %c0_i32_0 = arith.constant 0 : i32
    %c0_i32_1 = arith.constant 0 : i32
    return %c0_i32, %c0_i32_0 : i32, i32
  }
  func.func @transform_3(%arg0: i32, %arg1: i32) -> (i32, i32) {
    %c0_i32 = arith.constant 0 : i32
    %c0_i32_0 = arith.constant 0 : i32
    %c0_i32_1 = arith.constant 0 : i32
    return %c0_i32, %c0_i32_0 : i32, i32
  }
  func.func @transform_4(%arg0: i32, %arg1: i32) -> (i32, i32, i32) {
    %c0_i32 = arith.constant 0 : i32
    %c0_i32_0 = arith.constant 0 : i32
    return %arg0, %c0_i32, %arg1 : i32, i32, i32
  }
}

</mosaic_0001>

<bundles_post_ra>
// kernel: tpu_custom_call.1
= control target key start
LH: loop header
LB: loop body
LE: loop exit
PB: predicated region body
PF: predicated region fallthrough
CT: control target
= control target key end

     0   :  { %9 = vsyncpa [#allocation3], 0  ;;  %s3829_s0 = inlined_call_operand.vmem [shape: bf16[2,4,512], index: 0, kind: input, shape index: {}]   ;;  %s3830_s1 = inlined_call_operand.vmem [shape: bf16[32,4], index: 1, kind: input, shape index: {}]   ;;  %s3831_s2 = inlined_call_operand.vmem [shape: f32[32,1], index: 2, kind: input, shape index: {}]   ;;  %s3832_s3 = inlined_call_operand.hbm [shape: bf16[256,2048], index: 3, kind: input, shape index: {}]   ;;  %s3833_s4 = inlined_call_operand.hbm [shape: f32[2,32,4096], index: 4, kind: output, shape index: {}]  }
   0x1   :  { %10 = vsyncpa [#allocation4], 0 }
   0x2   :  { %12 = vsyncpa [#allocation4 + $0x1], 0  ;;  %s3381_s15 = smov 0   ;;  %s3383_s16 = smov 0  }
   0x3   :  { %s3385_s17 = smov 0   ;;  %s3387_s18 = smov 0  }
   0x4   :  { %s3389_s19 = smov 0   ;;  %s3391_s20 = smov 0  }
   0x5   :  { %s3393_s21 = smov 0   ;;  %s3395_s22 = smov 0  }
   0x6 LB: > { %s2827_s23 = sadd.s32 4294967295, %s3346_s22   ;;  %s2828_s24 = sadd.s32 4294967294, %s3346_s22   ;;  %s3346_s22 = sphi %s3395_s22, %s18_s22   ;;  %s3342_s21 = sphi %s3393_s21, %s3854_s21   ;;  %s3338_s20 = sphi %s3391_s20, %s3853_s20   ;;  %s3334_s19 = sphi %s3389_s19, %s3852_s19   ;;  %s3330_s18 = sphi %s3387_s18, %s3851_s18   ;;  %s3326_s17 = sphi %s3385_s17, %s3850_s17   ;;  %s3322_s16 = sphi %s3383_s16, %s3849_s16   ;;  %s3318_s15 = sphi %s3381_s15, %s3848_s15  }
   0x7   : > { %s27_s25 = sadd.s32 1, %s3338_s20  ;;  %s30_s26 = sadd.s32 1, %s3342_s21 }
   0x8   : > { %p28_p0 = scmp.ge.s32.totalorder %s27_s25, 2  ;;  %s130_s27 = sadd.s32 1, %s3326_s17 }
   0x9   : > { %p140_p1 = scmp.ne.s32.totalorder %s3326_s17, %s3322_s16  ;;  %p141_p2 = scmp.eq.s32.totalorder %s2827_s23, 3 }
   0xa   : > { %s3856_s25 = smov (%p28_p0, %s27_s25), 0  ;;  %s3858_s26 = smov (!%p28_p0, %s30_s26), %s3342_s21 }
   0xb   : > { %s126_s28 = ssub.s32 %s3338_s20, %s3856_s25  ;;  %p3433_p3 = por %p141_p2, %p140_p1 }
   0xc   : > { %p32_p4 = scmp.ge.s32.totalorder %s3858_s26, 2  ;;  %p146_p5 = scmp.ne.s32.totalorder %s3322_s16, %s3318_s15 }
   0xd   : > { %s3838_s29 = scalar_select %p3433_p3, 1, 0 }
   0xe   : > { %p147_p6 = scmp.eq.s32.totalorder %s2828_s24, 3  ;;  %p2829_p7 = scmp.ge.s32.totalorder %s3346_s22, 1 }
   0xf   : > { %s3860_s26 = smov (%p32_p4, %s3858_s26), 0  ;;  %p154_p9 = scmp.lt.s32.totalorder %s3346_s22, 5 }
  0x10   : > { %p3442_p8 = por %p147_p6, %p146_p5  ;;  %s125_s5 = ssub.s32 %s3342_s21, %s3860_s26 }
  0x11   : > { %s127_s6 = sor.u32 %s126_s28, %s125_s5  ;;  %p3449_p10 = pnand %p2829_p7, %p154_p9 }
  0x12   : > { %s3839_s30 = scalar_select %p3442_p8, 1, 0 }
  0x13   : > { %s3840_s7 = scalar_select %p3449_p10, 1, 0 }
  0x14   : > { %p128_p11 = scmp.eq.s32.totalorder %s127_s6, 0  ;;  %p3453_p12 = scmp.eq.s32.totalorder %s2827_s23, 0 }
  0x15   : > { %p3133_p13 = pneg %p3449_p10  ;;  %s3348_s10 = smov [#allocation2]  }
  0x16   : > { %s3841_s8 = scalar_select %p3453_p12, 1, 0 }
  0x17   : > { %s3460_s9 = scalar_select %p128_p11, %s3326_s17, %s130_s27  }
  0x18   : > { %s172_s11 = sshll.u32 %s3348_s10, 4  ;;  %p3464_p0 = pnand %p3453_p12, %p3133_p13  ;;  %s173_s11 = int_to_ptr.vmem [resolvable:$true] %s172_s11 }
  0x19   : > { %s3220_s23 = scalar_lea.hbm %s3832_s3, 32768 }
  0x1a   : > { %p3221_p1 = scmp.ne.s32.totalorder %s3832_s3, %s3220_s23  ;;  %p3222_p2 = pneg %p3464_p0 }
  0x1b   : > { %p3227_p6 = scmp.lt.u32.totalorder %s3220_s23, %s3832_s3 }
  0x1c   : > { %p3223_p4 = pnand %p3222_p2, %p3221_p1 }
  0x1e   : > { %p3224_p5 = pneg %p3223_p4 }
  0x20   : > { %p3229_p7 = pnand %p3227_p6, %p3224_p5 }
  0x22   : > { %3232 = shalt.err (!%p3229_p7)
}
  0x23   : > { %s3233_s6 = scalar_lea.vmem %s173_s11, 32768  ;;  %p3241_p8 = scmp.lt.s32.totalorder %s173_s11, %s173_s11 }
  0x24   : > { %p3234_p9 = scmp.ne.s32.totalorder %s173_s11, %s3233_s6  ;;  %p3242_p3 = scmp.lt.s32.totalorder %s3233_s6, %s3233_s6 }
  0x26   : > { %p3236_p11 = pnand %p3234_p9, %p3222_p2  ;;  %p3243_p12 = por %p3242_p3, %p3241_p8 }
  0x28   : > { %p3237_p13 = pneg %p3236_p11 }
  0x2a   : > { %p3244_p10 = pnand %p3243_p12, %p3237_p13 }
  0x2c   : > { %3247 = shalt.err (!%p3244_p10)
}
  0x2d   : > { %s3349_s10 = smov 1024   ;;  %s3350_s13 = smov 64  }
  0x2e   : > { %3136 = dma.hbm_to_vmem [thread:$0]  (!%p3464_p0), %s3832_s3, 32768, %s173_s11, [#allocation3], %s3349_s10, %s3349_s10, %s3350_s13  }
  0x2f   : > { %p3843_p1 = scmp.ne.s32.totalorder %s3840_s7, 0 }
  0x30   : > { %p3844_p4 = scmp.ne.s32.totalorder (!%p3843_p1), %s3841_s8, 0 }
  0x31   : > { %201 = sbr.rel (%p3843_p1) target bundleno = 777 (0x309), region = 36 }
  0x38   : > { %3309 = dma.done.wait (%p3844_p4), [#allocation3], 32768  }
  0x39   : > { %3311 = vsyncadd (%p3844_p4), [#allocation3], 4294934528  ;;  %v244_v0 = vld [vmem:[#allocation2] sm:$0xff]  ;;  %v245_v2 = vld [vmem:[#allocation2 + $0x8] sm:$0xff]  ;;  %s2835_s11 = sshll.u32 %s3330_s18, 1  ;;  %p232_p3 = scmp.lt.s32.totalorder %s3334_s19, 1 }
  0x3a   : > { %v252_v1 = vld [vmem:[#allocation2 + $0x40] sm:$0xff]  ;;  %v253_v4 = vld [vmem:[#allocation2 + $0x48] sm:$0xff]  ;;  %p3494_p8 = scmp.lt.s32.totalorder %s2835_s11, 3  ;;  %vm2180_vm0 = vcmask 1041408   ;;  %vm2173_vm1 = vcmask 31744   ;;  %s3122_s14 = sshll.u32 %s3330_s18, 4 }
  0x3b   : > { %v2840_v3 = vcombine.high %v244_v0, %v252_v1  ;;  %v2839_v5 = vcombine.low %v244_v0, %v252_v1  ;;  %v260_v6 = vld [vmem:[#allocation2 + $0x80] sm:$0xff]  ;;  %v2842_v8 = vcombine.high %v245_v2, %v253_v4  ;;  %v2841_v9 = vcombine.low %v245_v2, %v253_v4  ;;  %v261_v11 = vld [vmem:[#allocation2 + $0x88] sm:$0xff]  ;;  %s233_s8 = scalar_select %p232_p3, %s3334_s19, 1 }
  0x3c   : > { %v268_v7 = vld [vmem:[#allocation2 + $0xc0] sm:$0xff]  ;;  %v269_v12 = vld [vmem:[#allocation2 + $0xc8] sm:$0xff]  ;;  %s3862_s11 = smov (!%p3494_p8, %s2835_s11), 3  ;;  %s3123_s24 = sshll.u32 %s3334_s19, 7 }
  0x3d   : > { %v2856_v10 = vcombine.high %v260_v6, %v268_v7  ;;  %v276_v13 = vld [vmem:[#allocation2 + $0x100] sm:$0xff]  ;;  %1791 = vmatprep.subr.bf16.mxu0 %v2840_v3  ;;  %v2858_v14 = vcombine.high %v261_v11, %v269_v12  ;;  %v277_v16 = vld [vmem:[#allocation2 + $0x108] sm:$0xff]  ;;  %1832 = vmatprep.subr.bf16.mxu1 %v2842_v8  ;;  %v2855_v18 = vcombine.low %v260_v6, %v268_v7  ;;  %s2836_s12 = sshll.u32 %s233_s8, 2  ;;  %s2730_s18 = sadd.s32 %s3123_s24, %s3122_s14 }
  0x3e   : > { %v284_v15 = vld [vmem:[#allocation2 + $0x140] sm:$0xff]  ;;  %v285_v17 = vld [vmem:[#allocation2 + $0x148] sm:$0xff]  ;;  %1792 = vmatpush1.bf16.msra.mxu0 %v2839_v5  ;;  %1833 = vmatpush1.bf16.msra.mxu1 %v2841_v9  ;;  %v2857_v19 = vcombine.low %v261_v11, %v269_v12  ;;  %s237_s23 = sadd.s32 %s2836_s12, %s3862_s11  ;;  %s3124_s19 = sshll.u32 %s2730_s18, 7 }
  0x3f   : > { %1793 = vmatprep.subr.bf16.mxu0 %v2856_v10  ;;  %v2872_v20 = vcombine.high %v276_v13, %v284_v15  ;;  %1834 = vmatprep.subr.bf16.mxu1 %v2858_v14  ;;  %v2874_v21 = vcombine.high %v277_v16, %v285_v17  ;;  %v292_v22 = vld [vmem:[#allocation2 + $0x180] sm:$0xff]  ;;  %v293_v24 = vld [vmem:[#allocation2 + $0x188] sm:$0xff]  ;;  %v2871_v26 = vcombine.low %v276_v13, %v284_v15  ;;  %s2837_s28 = sshll.u32 %s237_s23, 1  ;;  %s3761_s12 = scalar_lea.hbm %s3833_s4, %s3124_s19 }
  0x40   : > { %v300_v23 = vld [vmem:[#allocation2 + $0x1c0] sm:$0xff]  ;;  %v301_v25 = vld [vmem:[#allocation2 + $0x1c8] sm:$0xff]  ;;  %v2873_v27 = vcombine.low %v277_v16, %v285_v17  ;;  %s3508_s6 = scalar_lea.vmem %s3829_s0, %s2837_s28  ;;  %p3846_p12 = scmp.ne.s32.totalorder %s3838_s29, 0 }
  0x41   : > { %v2888_v28 = vcombine.high %v292_v22, %v300_v23  ;;  %v2890_v29 = vcombine.high %v293_v24, %v301_v25  ;;  %v308_v30 = vld [vmem:[#allocation2 + $0x200] sm:$0xff]  ;;  %v309_v32 = vld [vmem:[#allocation2 + $0x208] sm:$0xff]  ;;  %v2887_v34 = vcombine.low %v292_v22, %v300_v23  ;;  %v2889_v35 = vcombine.low %v293_v24, %v301_v25  ;;  %s3352_s27 = smov [#allocation5]  }
  0x42   : > { %1794 = vmatpush1.bf16.msra.mxu0 %v2855_v18  ;;  %1835 = vmatpush1.bf16.msra.mxu1 %v2857_v19  ;;  %v316_v31 = vld [vmem:[#allocation2 + $0x240] sm:$0xff]  ;;  %v317_v33 = vld [vmem:[#allocation2 + $0x248] sm:$0xff]  ;;  %s3252_s5 = sshll.u32 %s3352_s27, 4  ;;  %s3253_s5 = int_to_ptr.vmem [resolvable:$false] %s3252_s5 }
  0x43   : > { %1795 = vmatprep.subr.bf16.mxu0 %v2872_v20  ;;  %1836 = vmatprep.subr.bf16.mxu1 %v2874_v21  ;;  %v2904_v36 = vcombine.high %v308_v30, %v316_v31  ;;  %v2906_v37 = vcombine.high %v309_v32, %v317_v33  ;;  %v324_v38 = vld [vmem:[#allocation2 + $0x280] sm:$0xff]  ;;  %v325_v40 = vld [vmem:[#allocation2 + $0x288] sm:$0xff]  ;;  %v2903_v42 = vcombine.low %v308_v30, %v316_v31 }
  0x44   : > { %v332_v39 = vld [vmem:[#allocation2 + $0x2c0] sm:$0xff]  ;;  %v333_v41 = vld [vmem:[#allocation2 + $0x2c8] sm:$0xff]  ;;  %v2905_v43 = vcombine.low %v309_v32, %v317_v33 }
  0x45   : > { %v2920_v44 = vcombine.high %v324_v38, %v332_v39  ;;  %v2922_v45 = vcombine.high %v325_v40, %v333_v41  ;;  %v340_v46 = vld [vmem:[#allocation2 + $0x300] sm:$0xff]  ;;  %v341_v48 = vld [vmem:[#allocation2 + $0x308] sm:$0xff]  ;;  %v2919_v50 = vcombine.low %v324_v38, %v332_v39  ;;  %v2921_v51 = vcombine.low %v325_v40, %v333_v41 }
  0x46   : > { %1796 = vmatpush1.bf16.msra.mxu0 %v2871_v26  ;;  %1837 = vmatpush1.bf16.msra.mxu1 %v2873_v27  ;;  %v348_v47 = vld [vmem:[#allocation2 + $0x340] sm:$0xff]  ;;  %v349_v49 = vld [vmem:[#allocation2 + $0x348] sm:$0xff] }
  0x47   : > { %1797 = vmatprep.subr.bf16.mxu0 %v2888_v28  ;;  %1838 = vmatprep.subr.bf16.mxu1 %v2890_v29  ;;  %v2936_v52 = vcombine.high %v340_v46, %v348_v47  ;;  %v3511_v53 = vld.sshfl [vmem:[%s3508_s6] sm:$0x33 pattern:$0x76325410]  ;;  %v2938_v54 = vcombine.high %v341_v48, %v349_v49  ;;  %v357_v58 = vld [vmem:[#allocation2 + $0x388] sm:$0xff]  ;;  %v2935_v60 = vcombine.low %v340_v46, %v348_v47 }
  0x48   : > { %v356_v55 = vld [vmem:[#allocation2 + $0x380] sm:$0xff]  ;;  %v3515_v57 = vcombine.high %v3511_v53, %v3511_v53  ;;  %v365_v59 = vld [vmem:[#allocation2 + $0x3c8] sm:$0xff]  ;;  %v2937_v61 = vcombine.low %v341_v48, %v349_v49 }
  0x49   : > { %v364_v56 = vld [vmem:[#allocation2 + $0x3c0] sm:$0xff]  ;;  %v2954_v63 = vcombine.high %v357_v58, %v365_v59  ;;  %v373_v2 = vld [vmem:[#allocation2 + $0x408] sm:$0xff]  ;;  %v2953_v5 = vcombine.low %v357_v58, %v365_v59 }
  0x4a   : > { %1798 = vmatpush1.bf16.msra.mxu0 %v2887_v34  ;;  %1839 = vmatpush1.bf16.msra.mxu1 %v2889_v35  ;;  %v2952_v62 = vcombine.high %v356_v55, %v364_v56  ;;  %v372_v0 = vld [vmem:[#allocation2 + $0x400] sm:$0xff]  ;;  %v381_v3 = vld [vmem:[#allocation2 + $0x448] sm:$0xff]  ;;  %v2951_v4 = vcombine.low %v356_v55, %v364_v56 }
  0x4b   : > { %1799 = vmatprep.subr.bf16.mxu0 %v2904_v36  ;;  %1840 = vmatprep.subr.bf16.mxu1 %v2906_v37  ;;  %v380_v1 = vld [vmem:[#allocation2 + $0x440] sm:$0xff]  ;;  %v2970_v7 = vcombine.high %v373_v2, %v381_v3  ;;  %v389_v10 = vld [vmem:[#allocation2 + $0x488] sm:$0xff]  ;;  %v2969_v13 = vcombine.low %v373_v2, %v381_v3  ;;  %v246_v2 = vld [vmem:[#allocation2 + $0x10] sm:$0xff] }
  0x4c   : > { %1823 = vmatprep.mubr.bf16.mxu0 %v3515_v57  ;;  %1864 = vmatprep.mubr.bf16.mxu1 %v3515_v57  ;;  %v2968_v6 = vcombine.high %v372_v0, %v380_v1  ;;  %v388_v8 = vld [vmem:[#allocation2 + $0x480] sm:$0xff]  ;;  %v397_v11 = vld [vmem:[#allocation2 + $0x4c8] sm:$0xff]  ;;  %v2967_v12 = vcombine.low %v372_v0, %v380_v1  ;;  %v254_v3 = vld [vmem:[#allocation2 + $0x50] sm:$0xff] }
  0x4d   : > { %v396_v9 = vld [vmem:[#allocation2 + $0x4c0] sm:$0xff]  ;;  %v2986_v15 = vcombine.high %v389_v10, %v397_v11  ;;  %v405_v18 = vld [vmem:[#allocation2 + $0x508] sm:$0xff]  ;;  %v2985_v21 = vcombine.low %v389_v10, %v397_v11  ;;  %v262_v10 = vld [vmem:[#allocation2 + $0x90] sm:$0xff] }
  0x4e   : > { %1800 = vmatpush1.bf16.msra.mxu0 %v2903_v42  ;;  %1841 = vmatpush1.bf16.msra.mxu1 %v2905_v43  ;;  %v2984_v14 = vcombine.high %v388_v8, %v396_v9  ;;  %v404_v16 = vld [vmem:[#allocation2 + $0x500] sm:$0xff]  ;;  %v413_v19 = vld [vmem:[#allocation2 + $0x548] sm:$0xff]  ;;  %v2983_v20 = vcombine.low %v388_v8, %v396_v9  ;;  %v2844_v8 = vcombine.high %v246_v2, %v254_v3  ;;  %v270_v11 = vld [vmem:[#allocation2 + $0xd0] sm:$0xff] }
  0x4f   : > { %1801 = vmatprep.subr.bf16.mxu0 %v2920_v44  ;;  %1842 = vmatprep.subr.bf16.mxu1 %v2922_v45  ;;  %v412_v17 = vld [vmem:[#allocation2 + $0x540] sm:$0xff]  ;;  %v3002_v23 = vcombine.high %v405_v18, %v413_v19  ;;  %v421_v26 = vld [vmem:[#allocation2 + $0x588] sm:$0xff]  ;;  %v3001_v29 = vcombine.low %v405_v18, %v413_v19  ;;  %v286_v19 = vld [vmem:[#allocation2 + $0x150] sm:$0xff] }
  0x50   : > { %v3000_v22 = vcombine.high %v404_v16, %v412_v17  ;;  %v420_v24 = vld [vmem:[#allocation2 + $0x580] sm:$0xff]  ;;  %v429_v27 = vld [vmem:[#allocation2 + $0x5c8] sm:$0xff]  ;;  %v2999_v28 = vcombine.low %v404_v16, %v412_v17  ;;  %v2860_v16 = vcombine.high %v262_v10, %v270_v11  ;;  %v278_v17 = vld [vmem:[#allocation2 + $0x110] sm:$0xff] }
  0x51   : > { %v428_v25 = vld [vmem:[#allocation2 + $0x5c0] sm:$0xff]  ;;  %v3018_v31 = vcombine.high %v421_v26, %v429_v27  ;;  %v437_v34 = vld [vmem:[#allocation2 + $0x608] sm:$0xff]  ;;  %v3017_v37 = vcombine.low %v421_v26, %v429_v27  ;;  %v294_v26 = vld [vmem:[#allocation2 + $0x190] sm:$0xff] }
  0x52   : > { %1802 = vmatpush1.bf16.msra.mxu0 %v2919_v50  ;;  %1843 = vmatpush1.bf16.msra.mxu1 %v2921_v51  ;;  %v3016_v30 = vcombine.high %v420_v24, %v428_v25  ;;  %v436_v32 = vld [vmem:[#allocation2 + $0x600] sm:$0xff]  ;;  %v445_v35 = vld [vmem:[#allocation2 + $0x648] sm:$0xff]  ;;  %v3015_v36 = vcombine.low %v420_v24, %v428_v25  ;;  %v2876_v24 = vcombine.high %v278_v17, %v286_v19  ;;  %v302_v27 = vld [vmem:[#allocation2 + $0x1d0] sm:$0xff] }
  0x53   : > { %1803 = vmatprep.subr.bf16.mxu0 %v2936_v52  ;;  %1844 = vmatprep.subr.bf16.mxu1 %v2938_v54  ;;  %v444_v33 = vld [vmem:[#allocation2 + $0x640] sm:$0xff]  ;;  %v3034_v39 = vcombine.high %v437_v34, %v445_v35  ;;  %v453_v42 = vld [vmem:[#allocation2 + $0x688] sm:$0xff]  ;;  %v3033_v45 = vcombine.low %v437_v34, %v445_v35  ;;  %v310_v34 = vld [vmem:[#allocation2 + $0x210] sm:$0xff] }
  0x54   : > { %v3032_v38 = vcombine.high %v436_v32, %v444_v33  ;;  %v452_v40 = vld [vmem:[#allocation2 + $0x680] sm:$0xff]  ;;  %v461_v43 = vld [vmem:[#allocation2 + $0x6c8] sm:$0xff]  ;;  %v3031_v44 = vcombine.low %v436_v32, %v444_v33  ;;  %v2892_v32 = vcombine.high %v294_v26, %v302_v27  ;;  %v318_v35 = vld [vmem:[#allocation2 + $0x250] sm:$0xff] }
  0x55   : > { %v460_v41 = vld [vmem:[#allocation2 + $0x6c0] sm:$0xff]  ;;  %v3050_v47 = vcombine.high %v453_v42, %v461_v43  ;;  %v469_v50 = vld [vmem:[#allocation2 + $0x708] sm:$0xff]  ;;  %v3049_v54 = vcombine.low %v453_v42, %v461_v43  ;;  %v326_v42 = vld [vmem:[#allocation2 + $0x290] sm:$0xff] }
  0x56   : > { %1804 = vmatpush1.bf16.msra.mxu0 %v2935_v60  ;;  %1845 = vmatpush1.bf16.msra.mxu1 %v2937_v61  ;;  %v3048_v46 = vcombine.high %v452_v40, %v460_v41  ;;  %v468_v48 = vld [vmem:[#allocation2 + $0x700] sm:$0xff]  ;;  %v477_v51 = vld [vmem:[#allocation2 + $0x748] sm:$0xff]  ;;  %v3047_v52 = vcombine.low %v452_v40, %v460_v41  ;;  %v2908_v40 = vcombine.high %v310_v34, %v318_v35  ;;  %v334_v43 = vld [vmem:[#allocation2 + $0x2d0] sm:$0xff] }
  0x57   : > { %1805 = vmatprep.subr.bf16.mxu0 %v2952_v62  ;;  %1846 = vmatprep.subr.bf16.mxu1 %v2954_v63  ;;  %v476_v49 = vld [vmem:[#allocation2 + $0x740] sm:$0xff]  ;;  %v3066_v56 = vcombine.high %v469_v50, %v477_v51  ;;  %v485_v60 = vld [vmem:[#allocation2 + $0x788] sm:$0xff]  ;;  %v3065_v63 = vcombine.low %v469_v50, %v477_v51  ;;  %v342_v50 = vld [vmem:[#allocation2 + $0x310] sm:$0xff] }
  0x58   : > { %v3064_v55 = vcombine.high %v468_v48, %v476_v49  ;;  %v484_v58 = vld [vmem:[#allocation2 + $0x780] sm:$0xff]  ;;  %v493_v61 = vld [vmem:[#allocation2 + $0x7c8] sm:$0xff]  ;;  %v3063_v62 = vcombine.low %v468_v48, %v476_v49  ;;  %v2924_v48 = vcombine.high %v326_v42, %v334_v43  ;;  %v350_v51 = vld [vmem:[#allocation2 + $0x350] sm:$0xff] }
  0x59   : > { %v492_v59 = vld [vmem:[#allocation2 + $0x7c0] sm:$0xff]  ;;  %v3082_v1 = vcombine.high %v485_v60, %v493_v61 }
  0x5a   : > { %1806 = vmatpush1.bf16.msra.mxu0 %v2951_v4  ;;  %1847 = vmatpush1.bf16.msra.mxu1 %v2953_v5  ;;  %v3080_v0 = vcombine.high %v484_v58, %v492_v59  ;;  %v247_v4 = vld [vmem:[#allocation2 + $0x18] sm:$0xff] }
  0x5b   : > { %1807 = vmatprep.subr.bf16.mxu0 %v2968_v6  ;;  %1848 = vmatprep.subr.bf16.mxu1 %v2970_v7  ;;  %v255_v5 = vld [vmem:[#allocation2 + $0x58] sm:$0xff]  ;;  %v3079_v6 = vcombine.low %v484_v58, %v492_v59  ;;  %v3081_v7 = vcombine.low %v485_v60, %v493_v61  ;;  %v2940_v58 = vcombine.high %v342_v50, %v350_v51  ;;  %v358_v60 = vld [vmem:[#allocation2 + $0x390] sm:$0xff] }
  0x5c   : > { %v2846_v9 = vcombine.high %v247_v4, %v255_v5  ;;  %v366_v61 = vld [vmem:[#allocation2 + $0x3d0] sm:$0xff] }
  0x5e   : > { %1808 = vmatpush1.bf16.msra.mxu0 %v2967_v12  ;;  %1849 = vmatpush1.bf16.msra.mxu1 %v2969_v13  ;;  %v263_v12 = vld [vmem:[#allocation2 + $0x98] sm:$0xff] }
  0x5f   : > { %1809 = vmatprep.subr.bf16.mxu0 %v2984_v14  ;;  %1850 = vmatprep.subr.bf16.mxu1 %v2986_v15  ;;  %v271_v13 = vld [vmem:[#allocation2 + $0xd8] sm:$0xff]  ;;  %v2843_v14 = vcombine.low %v246_v2, %v254_v3  ;;  %v2845_v15 = vcombine.low %v247_v4, %v255_v5  ;;  %v2956_v2 = vcombine.high %v358_v60, %v366_v61  ;;  %v374_v4 = vld [vmem:[#allocation2 + $0x410] sm:$0xff] }
  0x60   : > { %v2862_v18 = vcombine.high %v263_v12, %v271_v13  ;;  %v382_v5 = vld [vmem:[#allocation2 + $0x450] sm:$0xff] }
  0x62   : > { %1810 = vmatpush1.bf16.msra.mxu0 %v2983_v20  ;;  %1851 = vmatpush1.bf16.msra.mxu1 %v2985_v21  ;;  %v279_v20 = vld [vmem:[#allocation2 + $0x118] sm:$0xff] }
  0x63   : > { %1811 = vmatprep.subr.bf16.mxu0 %v3000_v22  ;;  %1852 = vmatprep.subr.bf16.mxu1 %v3002_v23  ;;  %v287_v21 = vld [vmem:[#allocation2 + $0x158] sm:$0xff]  ;;  %v2859_v22 = vcombine.low %v262_v10, %v270_v11  ;;  %v2861_v23 = vcombine.low %v263_v12, %v271_v13  ;;  %v2972_v10 = vcombine.high %v374_v4, %v382_v5  ;;  %v390_v12 = vld [vmem:[#allocation2 + $0x490] sm:$0xff] }
  0x64   : > { %v2878_v25 = vcombine.high %v279_v20, %v287_v21  ;;  %v398_v13 = vld [vmem:[#allocation2 + $0x4d0] sm:$0xff] }
  0x66   : > { %1812 = vmatpush1.bf16.msra.mxu0 %v2999_v28  ;;  %1853 = vmatpush1.bf16.msra.mxu1 %v3001_v29  ;;  %v295_v28 = vld [vmem:[#allocation2 + $0x198] sm:$0xff] }
  0x67   : > { %1813 = vmatprep.subr.bf16.mxu0 %v3016_v30  ;;  %1854 = vmatprep.subr.bf16.mxu1 %v3018_v31  ;;  %v303_v29 = vld [vmem:[#allocation2 + $0x1d8] sm:$0xff]  ;;  %v2875_v30 = vcombine.low %v278_v17, %v286_v19  ;;  %v2877_v31 = vcombine.low %v279_v20, %v287_v21  ;;  %v406_v20 = vld [vmem:[#allocation2 + $0x510] sm:$0xff] }
  0x68   : > { %v2894_v33 = vcombine.high %v295_v28, %v303_v29  ;;  %v414_v21 = vld [vmem:[#allocation2 + $0x550] sm:$0xff] }
  0x6a   : > { %1814 = vmatpush1.bf16.msra.mxu0 %v3015_v36  ;;  %1855 = vmatpush1.bf16.msra.mxu1 %v3017_v37  ;;  %v311_v36 = vld [vmem:[#allocation2 + $0x218] sm:$0xff] }
  0x6b   : > { %1815 = vmatprep.subr.bf16.mxu0 %v3032_v38  ;;  %1856 = vmatprep.subr.bf16.mxu1 %v3034_v39  ;;  %v319_v37 = vld [vmem:[#allocation2 + $0x258] sm:$0xff]  ;;  %v2891_v38 = vcombine.low %v294_v26, %v302_v27  ;;  %v2893_v39 = vcombine.low %v295_v28, %v303_v29  ;;  %v3004_v26 = vcombine.high %v406_v20, %v414_v21  ;;  %v422_v28 = vld [vmem:[#allocation2 + $0x590] sm:$0xff] }
  0x6c   : > { %v2910_v41 = vcombine.high %v311_v36, %v319_v37  ;;  %v430_v29 = vld [vmem:[#allocation2 + $0x5d0] sm:$0xff] }
  0x6e   : > { %1816 = vmatpush1.bf16.msra.mxu0 %v3031_v44  ;;  %1857 = vmatpush1.bf16.msra.mxu1 %v3033_v45  ;;  %v327_v44 = vld [vmem:[#allocation2 + $0x298] sm:$0xff] }
  0x6f   : > { %1817 = vmatprep.subr.bf16.mxu0 %v3048_v46  ;;  %1858 = vmatprep.subr.bf16.mxu1 %v3050_v47  ;;  %v335_v45 = vld [vmem:[#allocation2 + $0x2d8] sm:$0xff]  ;;  %v2907_v46 = vcombine.low %v310_v34, %v318_v35  ;;  %v2909_v47 = vcombine.low %v311_v36, %v319_v37  ;;  %v3020_v34 = vcombine.high %v422_v28, %v430_v29  ;;  %v438_v36 = vld [vmem:[#allocation2 + $0x610] sm:$0xff] }
  0x70   : > { %v2926_v49 = vcombine.high %v327_v44, %v335_v45  ;;  %v446_v37 = vld [vmem:[#allocation2 + $0x650] sm:$0xff] }
  0x72   : > { %1818 = vmatpush1.bf16.msra.mxu0 %v3047_v52  ;;  %1859 = vmatpush1.bf16.msra.mxu1 %v3049_v54  ;;  %v343_v52 = vld [vmem:[#allocation2 + $0x318] sm:$0xff] }
  0x73   : > { %1819 = vmatprep.subr.bf16.mxu0 %v3064_v55  ;;  %1860 = vmatprep.subr.bf16.mxu1 %v3066_v56  ;;  %v351_v54 = vld [vmem:[#allocation2 + $0x358] sm:$0xff]  ;;  %v2923_v55 = vcombine.low %v326_v42, %v334_v43  ;;  %v2925_v56 = vcombine.low %v327_v44, %v335_v45  ;;  %v3036_v42 = vcombine.high %v438_v36, %v446_v37  ;;  %v454_v44 = vld [vmem:[#allocation2 + $0x690] sm:$0xff] }
  0x74   : > { %v2942_v59 = vcombine.high %v343_v52, %v351_v54  ;;  %v462_v45 = vld [vmem:[#allocation2 + $0x6d0] sm:$0xff] }
  0x76   : > { %1820 = vmatpush1.bf16.msra.mxu0 %v3063_v62  ;;  %1861 = vmatpush1.bf16.msra.mxu1 %v3065_v63  ;;  %v359_v62 = vld [vmem:[#allocation2 + $0x398] sm:$0xff] }
  0x77   : > { %1821 = vmatprep.subr.bf16.mxu0 %v3080_v0  ;;  %1862 = vmatprep.subr.bf16.mxu1 %v3082_v1  ;;  %v367_v63 = vld [vmem:[#allocation2 + $0x3d8] sm:$0xff]  ;;  %v2939_v0 = vcombine.low %v342_v50, %v350_v51  ;;  %v2941_v1 = vcombine.low %v343_v52, %v351_v54  ;;  %v3052_v50 = vcombine.high %v454_v44, %v462_v45  ;;  %v470_v52 = vld [vmem:[#allocation2 + $0x710] sm:$0xff] }
  0x78   : > { %v2958_v3 = vcombine.high %v359_v62, %v367_v63  ;;  %v478_v54 = vld [vmem:[#allocation2 + $0x750] sm:$0xff] }
  0x7a   : > { %1822 = vmatpush1.bf16.msra.mxu0 %v3079_v6  ;;  %1863 = vmatpush1.bf16.msra.mxu1 %v3081_v7  ;;  %v375_v6 = vld [vmem:[#allocation2 + $0x418] sm:$0xff] }
  0x7b   : > { %1873 = vmatprep.subr.bf16.mxu0 %v2844_v8  ;;  %1914 = vmatprep.subr.bf16.mxu1 %v2846_v9  ;;  %v383_v7 = vld [vmem:[#allocation2 + $0x458] sm:$0xff]  ;;  %v2955_v8 = vcombine.low %v358_v60, %v366_v61  ;;  %v2957_v9 = vcombine.low %v359_v62, %v367_v63  ;;  %v3068_v60 = vcombine.high %v470_v52, %v478_v54  ;;  %v486_v62 = vld [vmem:[#allocation2 + $0x790] sm:$0xff] }
  0x7c   : > { %v2974_v11 = vcombine.high %v375_v6, %v383_v7  ;;  %v2973_v17 = vcombine.low %v375_v6, %v383_v7  ;;  %v494_v63 = vld [vmem:[#allocation2 + $0x7d0] sm:$0xff]  ;;  %v248_v6 = vld [vmem:[#allocation2 + $0x20] sm:$0xff] }
  0x7d   : > { %1824 = vmatmul.mubr.bf16.vlgmr.msra.gmra.mrb[0].mxu0 %v3511_v53  ;;  %1865 = vmatmul.mubr.bf16.vlgmr.msra.gmra.mrb[0].mxu1 %v3511_v53  ;;  %v256_v7 = vld [vmem:[#allocation2 + $0x60] sm:$0xff] }
  0x7e   : > { %1874 = vmatpush1.bf16.msra.mxu0 %v2843_v14  ;;  %1915 = vmatpush1.bf16.msra.mxu1 %v2845_v15  ;;  %v391_v14 = vld [vmem:[#allocation2 + $0x498] sm:$0xff] }
  0x7f   : > { %1875 = vmatprep.subr.bf16.mxu0 %v2860_v16  ;;  %1916 = vmatprep.subr.bf16.mxu1 %v2862_v18  ;;  %v399_v15 = vld [vmem:[#allocation2 + $0x4d8] sm:$0xff]  ;;  %v2971_v16 = vcombine.low %v374_v4, %v382_v5  ;;  %v2988_v18 = vcombine.high %v390_v12, %v398_v13  ;;  %v3084_v4 = vcombine.high %v486_v62, %v494_v63 }
  0x80   : > { %1905 = vmatprep.mubr.bf16.mxu0 %v3515_v57  ;;  %1946 = vmatprep.mubr.bf16.mxu1 %v3515_v57  ;;  %v2990_v19 = vcombine.high %v391_v14, %v399_v15 }
  0x82   : > { %1876 = vmatpush1.bf16.msra.mxu0 %v2859_v22  ;;  %1917 = vmatpush1.bf16.msra.mxu1 %v2861_v23  ;;  %v407_v22 = vld [vmem:[#allocation2 + $0x518] sm:$0xff] }
  0x83   : > { %1877 = vmatprep.subr.bf16.mxu0 %v2876_v24  ;;  %1918 = vmatprep.subr.bf16.mxu1 %v2878_v25  ;;  %v415_v23 = vld [vmem:[#allocation2 + $0x558] sm:$0xff]  ;;  %v2987_v24 = vcombine.low %v390_v12, %v398_v13  ;;  %v2989_v25 = vcombine.low %v391_v14, %v399_v15  ;;  %v2848_v12 = vcombine.high %v248_v6, %v256_v7  ;;  %v264_v14 = vld [vmem:[#allocation2 + $0xa0] sm:$0xff] }
  0x84   : > { %v3006_v27 = vcombine.high %v407_v22, %v415_v23  ;;  %v272_v15 = vld [vmem:[#allocation2 + $0xe0] sm:$0xff] }
  0x86   : > { %1878 = vmatpush1.bf16.msra.mxu0 %v2875_v30  ;;  %1919 = vmatpush1.bf16.msra.mxu1 %v2877_v31  ;;  %v423_v30 = vld [vmem:[#allocation2 + $0x598] sm:$0xff] }
  0x87   : > { %1879 = vmatprep.subr.bf16.mxu0 %v2892_v32  ;;  %1920 = vmatprep.subr.bf16.mxu1 %v2894_v33  ;;  %v431_v31 = vld [vmem:[#allocation2 + $0x5d8] sm:$0xff]  ;;  %v3003_v32 = vcombine.low %v406_v20, %v414_v21  ;;  %v3005_v33 = vcombine.low %v407_v22, %v415_v23  ;;  %v2864_v20 = vcombine.high %v264_v14, %v272_v15  ;;  %v280_v22 = vld [vmem:[#allocation2 + $0x120] sm:$0xff] }
  0x88   : > { %v3022_v35 = vcombine.high %v423_v30, %v431_v31  ;;  %v288_v23 = vld [vmem:[#allocation2 + $0x160] sm:$0xff] }
  0x8a   : > { %1880 = vmatpush1.bf16.msra.mxu0 %v2891_v38  ;;  %1921 = vmatpush1.bf16.msra.mxu1 %v2893_v39  ;;  %v439_v38 = vld [vmem:[#allocation2 + $0x618] sm:$0xff] }
  0x8b   : > { %1881 = vmatprep.subr.bf16.mxu0 %v2908_v40  ;;  %1922 = vmatprep.subr.bf16.mxu1 %v2910_v41  ;;  %v447_v39 = vld [vmem:[#allocation2 + $0x658] sm:$0xff]  ;;  %v3019_v40 = vcombine.low %v422_v28, %v430_v29  ;;  %v3021_v41 = vcombine.low %v423_v30, %v431_v31  ;;  %v2880_v28 = vcombine.high %v280_v22, %v288_v23  ;;  %v296_v30 = vld [vmem:[#allocation2 + $0x1a0] sm:$0xff] }
  0x8c   : > { %v3038_v43 = vcombine.high %v439_v38, %v447_v39  ;;  %v304_v31 = vld [vmem:[#allocation2 + $0x1e0] sm:$0xff] }
  0x8e   : > { %1882 = vmatpush1.bf16.msra.mxu0 %v2907_v46  ;;  %1923 = vmatpush1.bf16.msra.mxu1 %v2909_v47  ;;  %v455_v46 = vld [vmem:[#allocation2 + $0x698] sm:$0xff] }
  0x8f   : > { %1883 = vmatprep.subr.bf16.mxu0 %v2924_v48  ;;  %1924 = vmatprep.subr.bf16.mxu1 %v2926_v49  ;;  %v463_v47 = vld [vmem:[#allocation2 + $0x6d8] sm:$0xff]  ;;  %v3035_v48 = vcombine.low %v438_v36, %v446_v37  ;;  %v3037_v49 = vcombine.low %v439_v38, %v447_v39  ;;  %v312_v37 = vld [vmem:[#allocation2 + $0x220] sm:$0xff]  ;;  %v313_v39 = vld [vmem:[#allocation2 + $0x228] sm:$0xff] }
  0x90   : > { %v3054_v51 = vcombine.high %v455_v46, %v463_v47  ;;  %v320_v38 = vld [vmem:[#allocation2 + $0x260] sm:$0xff] }
  0x92   : > { %1884 = vmatpush1.bf16.msra.mxu0 %v2923_v55  ;;  %1925 = vmatpush1.bf16.msra.mxu1 %v2925_v56  ;;  %v471_v55 = vld [vmem:[#allocation2 + $0x718] sm:$0xff] }
  0x93   : > { %1885 = vmatprep.subr.bf16.mxu0 %v2940_v58  ;;  %1926 = vmatprep.subr.bf16.mxu1 %v2942_v59  ;;  %v479_v56 = vld [vmem:[#allocation2 + $0x758] sm:$0xff]  ;;  %v3051_v58 = vcombine.low %v454_v44, %v462_v45  ;;  %v3053_v59 = vcombine.low %v455_v46, %v463_v47  ;;  %v328_v45 = vld [vmem:[#allocation2 + $0x2a0] sm:$0xff]  ;;  %v329_v47 = vld [vmem:[#allocation2 + $0x2a8] sm:$0xff] }
  0x94   : > { %v3070_v61 = vcombine.high %v471_v55, %v479_v56  ;;  %v336_v46 = vld [vmem:[#allocation2 + $0x2e0] sm:$0xff] }
  0x96   : > { %1886 = vmatpush1.bf16.msra.mxu0 %v2939_v0  ;;  %1927 = vmatpush1.bf16.msra.mxu1 %v2941_v1  ;;  %v487_v0 = vld [vmem:[#allocation2 + $0x798] sm:$0xff] }
  0x97   : > { %1887 = vmatprep.subr.bf16.mxu0 %v2956_v2  ;;  %1928 = vmatprep.subr.bf16.mxu1 %v2958_v3  ;;  %v495_v1 = vld [vmem:[#allocation2 + $0x7d8] sm:$0xff]  ;;  %v3067_v2 = vcombine.low %v470_v52, %v478_v54  ;;  %v3069_v3 = vcombine.low %v471_v55, %v479_v56  ;;  %v344_v54 = vld [vmem:[#allocation2 + $0x320] sm:$0xff]  ;;  %v345_v56 = vld [vmem:[#allocation2 + $0x328] sm:$0xff] }
  0x98   : > { %v3086_v5 = vcombine.high %v487_v0, %v495_v1  ;;  %v352_v55 = vld [vmem:[#allocation2 + $0x360] sm:$0xff] }
  0x9a   : > { %1888 = vmatpush1.bf16.msra.mxu0 %v2955_v8  ;;  %1929 = vmatpush1.bf16.msra.mxu1 %v2957_v9  ;;  %v249_v8 = vld [vmem:[#allocation2 + $0x28] sm:$0xff] }
  0x9b   : > { %1889 = vmatprep.subr.bf16.mxu0 %v2972_v10  ;;  %1930 = vmatprep.subr.bf16.mxu1 %v2974_v11  ;;  %v257_v9 = vld [vmem:[#allocation2 + $0x68] sm:$0xff]  ;;  %v3083_v10 = vcombine.low %v486_v62, %v494_v63  ;;  %v3085_v11 = vcombine.low %v487_v0, %v495_v1  ;;  %v360_v63 = vld [vmem:[#allocation2 + $0x3a0] sm:$0xff] }
  0x9c   : > { %v2850_v13 = vcombine.high %v249_v8, %v257_v9  ;;  %v368_v0 = vld [vmem:[#allocation2 + $0x3e0] sm:$0xff]  ;;  %v361_v1 = vld [vmem:[#allocation2 + $0x3a8] sm:$0xff] }
  0x9e   : > { %1890 = vmatpush1.bf16.msra.mxu0 %v2971_v16  ;;  %1931 = vmatpush1.bf16.msra.mxu1 %v2973_v17  ;;  %v265_v16 = vld [vmem:[#allocation2 + $0xa8] sm:$0xff] }
  0x9f   : > { %1891 = vmatprep.subr.bf16.mxu0 %v2988_v18  ;;  %1932 = vmatprep.subr.bf16.mxu1 %v2990_v19  ;;  %v273_v17 = vld [vmem:[#allocation2 + $0xe8] sm:$0xff]  ;;  %v2847_v18 = vcombine.low %v248_v6, %v256_v7  ;;  %v2849_v19 = vcombine.low %v249_v8, %v257_v9  ;;  %v376_v7 = vld [vmem:[#allocation2 + $0x420] sm:$0xff] }
  0xa0   : > { %v2866_v21 = vcombine.high %v265_v16, %v273_v17  ;;  %v384_v8 = vld [vmem:[#allocation2 + $0x460] sm:$0xff]  ;;  %v377_v9 = vld [vmem:[#allocation2 + $0x428] sm:$0xff] }
  0xa2   : > { %1892 = vmatpush1.bf16.msra.mxu0 %v2987_v24  ;;  %1933 = vmatpush1.bf16.msra.mxu1 %v2989_v25  ;;  %v281_v24 = vld [vmem:[#allocation2 + $0x128] sm:$0xff] }
  0xa3   : > { %1893 = vmatprep.subr.bf16.mxu0 %v3004_v26  ;;  %1934 = vmatprep.subr.bf16.mxu1 %v3006_v27  ;;  %v289_v25 = vld [vmem:[#allocation2 + $0x168] sm:$0xff]  ;;  %v2863_v26 = vcombine.low %v264_v14, %v272_v15  ;;  %v2865_v27 = vcombine.low %v265_v16, %v273_v17  ;;  %v392_v15 = vld [vmem:[#allocation2 + $0x4a0] sm:$0xff] }
  0xa4   : > { %v2882_v29 = vcombine.high %v281_v24, %v289_v25  ;;  %v400_v16 = vld [vmem:[#allocation2 + $0x4e0] sm:$0xff]  ;;  %v393_v17 = vld [vmem:[#allocation2 + $0x4a8] sm:$0xff] }
  0xa6   : > { %1894 = vmatpush1.bf16.msra.mxu0 %v3003_v32  ;;  %1935 = vmatpush1.bf16.msra.mxu1 %v3005_v33  ;;  %v297_v32 = vld [vmem:[#allocation2 + $0x1a8] sm:$0xff] }
  0xa7   : > { %1895 = vmatprep.subr.bf16.mxu0 %v3020_v34  ;;  %1936 = vmatprep.subr.bf16.mxu1 %v3022_v35  ;;  %v305_v33 = vld [vmem:[#allocation2 + $0x1e8] sm:$0xff]  ;;  %v2879_v34 = vcombine.low %v280_v22, %v288_v23  ;;  %v2896_v35 = vcombine.high %v296_v30, %v304_v31  ;;  %v408_v23 = vld [vmem:[#allocation2 + $0x520] sm:$0xff] }
  0xa8   : > { %v2898_v36 = vcombine.high %v297_v32, %v305_v33 }
  0xaa   : > { %1896 = vmatpush1.bf16.msra.mxu0 %v3019_v40  ;;  %1937 = vmatpush1.bf16.msra.mxu1 %v3021_v41  ;;  %v321_v40 = vld [vmem:[#allocation2 + $0x268] sm:$0xff]  ;;  %v2895_v41 = vcombine.low %v296_v30, %v304_v31  ;;  %v424_v31 = vld [vmem:[#allocation2 + $0x5a0] sm:$0xff] }
  0xab   : > { %1897 = vmatprep.subr.bf16.mxu0 %v3036_v42  ;;  %1938 = vmatprep.subr.bf16.mxu1 %v3038_v43  ;;  %v2897_v42 = vcombine.low %v297_v32, %v305_v33  ;;  %v2912_v43 = vcombine.high %v312_v37, %v320_v38  ;;  %v2914_v44 = vcombine.high %v313_v39, %v321_v40  ;;  %v432_v32 = vld [vmem:[#allocation2 + $0x5e0] sm:$0xff]  ;;  %v425_v33 = vld [vmem:[#allocation2 + $0x5a8] sm:$0xff] }
  0xae   : > { %1898 = vmatpush1.bf16.msra.mxu0 %v3035_v48  ;;  %1939 = vmatpush1.bf16.msra.mxu1 %v3037_v49  ;;  %v337_v48 = vld [vmem:[#allocation2 + $0x2e8] sm:$0xff]  ;;  %v2911_v49 = vcombine.low %v312_v37, %v320_v38  ;;  %v440_v38 = vld [vmem:[#allocation2 + $0x620] sm:$0xff] }
  0xaf   : > { %1899 = vmatprep.subr.bf16.mxu0 %v3052_v50  ;;  %1940 = vmatprep.subr.bf16.mxu1 %v3054_v51  ;;  %v2913_v50 = vcombine.low %v313_v39, %v321_v40  ;;  %v2928_v51 = vcombine.high %v328_v45, %v336_v46  ;;  %v2930_v52 = vcombine.high %v329_v47, %v337_v48  ;;  %v448_v39 = vld [vmem:[#allocation2 + $0x660] sm:$0xff]  ;;  %v441_v40 = vld [vmem:[#allocation2 + $0x628] sm:$0xff] }
  0xb2   : > { %1900 = vmatpush1.bf16.msra.mxu0 %v3051_v58  ;;  %1941 = vmatpush1.bf16.msra.mxu1 %v3053_v59  ;;  %v353_v58 = vld [vmem:[#allocation2 + $0x368] sm:$0xff]  ;;  %v2927_v59 = vcombine.low %v328_v45, %v336_v46  ;;  %v456_v46 = vld [vmem:[#allocation2 + $0x6a0] sm:$0xff] }
  0xb3   : > { %1901 = vmatprep.subr.bf16.mxu0 %v3068_v60  ;;  %1942 = vmatprep.subr.bf16.mxu1 %v3070_v61  ;;  %v2929_v60 = vcombine.low %v329_v47, %v337_v48  ;;  %v2944_v61 = vcombine.high %v344_v54, %v352_v55  ;;  %v2946_v62 = vcombine.high %v345_v56, %v353_v58  ;;  %v464_v47 = vld [vmem:[#allocation2 + $0x6e0] sm:$0xff]  ;;  %v457_v48 = vld [vmem:[#allocation2 + $0x6a8] sm:$0xff] }
  0xb6   : > { %1902 = vmatpush1.bf16.msra.mxu0 %v3067_v2  ;;  %1943 = vmatpush1.bf16.msra.mxu1 %v3069_v3  ;;  %v369_v2 = vld [vmem:[#allocation2 + $0x3e8] sm:$0xff]  ;;  %v2943_v3 = vcombine.low %v344_v54, %v352_v55  ;;  %v472_v55 = vld [vmem:[#allocation2 + $0x720] sm:$0xff] }
  0xb7   : > { %1903 = vmatprep.subr.bf16.mxu0 %v3084_v4  ;;  %1944 = vmatprep.subr.bf16.mxu1 %v3086_v5  ;;  %v2945_v4 = vcombine.low %v345_v56, %v353_v58  ;;  %v2960_v5 = vcombine.high %v360_v63, %v368_v0  ;;  %v2962_v6 = vcombine.high %v361_v1, %v369_v2  ;;  %v480_v56 = vld [vmem:[#allocation2 + $0x760] sm:$0xff]  ;;  %v473_v58 = vld [vmem:[#allocation2 + $0x728] sm:$0xff] }
  0xba   : > { %1904 = vmatpush1.bf16.msra.mxu0 %v3083_v10  ;;  %1945 = vmatpush1.bf16.msra.mxu1 %v3085_v11  ;;  %v385_v10 = vld [vmem:[#allocation2 + $0x468] sm:$0xff]  ;;  %v2959_v11 = vcombine.low %v360_v63, %v368_v0  ;;  %v488_v0 = vld [vmem:[#allocation2 + $0x7a0] sm:$0xff] }
  0xbb   : > { %1955 = vmatprep.subr.bf16.mxu0 %v2848_v12  ;;  %1996 = vmatprep.subr.bf16.mxu1 %v2850_v13  ;;  %v2961_v12 = vcombine.low %v361_v1, %v369_v2  ;;  %v2976_v13 = vcombine.high %v376_v7, %v384_v8  ;;  %v2978_v14 = vcombine.high %v377_v9, %v385_v10  ;;  %v496_v1 = vld [vmem:[#allocation2 + $0x7e0] sm:$0xff]  ;;  %v489_v2 = vld [vmem:[#allocation2 + $0x7a8] sm:$0xff] }
  0xbd   : > { %1906 = vmatmul.mubr.bf16.vlgmr.msra.gmra.mrb[4].mxu0 %v3511_v53  ;;  %1947 = vmatmul.mubr.bf16.vlgmr.msra.gmra.mrb[4].mxu1 %v3511_v53  ;;  %v2881_v53 = vcombine.low %v281_v24, %v289_v25  ;;  %v416_v24 = vld [vmem:[#allocation2 + $0x560] sm:$0xff]  ;;  %v409_v25 = vld [vmem:[#allocation2 + $0x528] sm:$0xff] }
  0xbe   : > { %1956 = vmatpush1.bf16.msra.mxu0 %v2847_v18  ;;  %1997 = vmatpush1.bf16.msra.mxu1 %v2849_v19  ;;  %v401_v18 = vld [vmem:[#allocation2 + $0x4e8] sm:$0xff]  ;;  %v2975_v19 = vcombine.low %v376_v7, %v384_v8  ;;  %v250_v8 = vld [vmem:[#allocation2 + $0x30] sm:$0xff] }
  0xbf   : > { %1957 = vmatprep.subr.bf16.mxu0 %v2864_v20  ;;  %1998 = vmatprep.subr.bf16.mxu1 %v2866_v21  ;;  %v2977_v20 = vcombine.low %v377_v9, %v385_v10  ;;  %v2992_v21 = vcombine.high %v392_v15, %v400_v16  ;;  %v2994_v22 = vcombine.high %v393_v17, %v401_v18  ;;  %v258_v9 = vld [vmem:[#allocation2 + $0x70] sm:$0xff]  ;;  %v251_v10 = vld [vmem:[#allocation2 + $0x38] sm:$0xff] }
  0xc0   : > { %1987 = vmatprep.mubr.bf16.mxu0 %v3515_v57  ;;  %2028 = vmatprep.mubr.bf16.mxu1 %v3515_v57 }
  0xc2   : > { %1958 = vmatpush1.bf16.msra.mxu0 %v2863_v26  ;;  %1999 = vmatpush1.bf16.msra.mxu1 %v2865_v27  ;;  %v417_v26 = vld [vmem:[#allocation2 + $0x568] sm:$0xff]  ;;  %v2991_v27 = vcombine.low %v392_v15, %v400_v16  ;;  %v266_v16 = vld [vmem:[#allocation2 + $0xb0] sm:$0xff] }
  0xc3   : > { %1959 = vmatprep.subr.bf16.mxu0 %v2880_v28  ;;  %2000 = vmatprep.subr.bf16.mxu1 %v2882_v29  ;;  %v2993_v28 = vcombine.low %v393_v17, %v401_v18  ;;  %v3008_v29 = vcombine.high %v408_v23, %v416_v24  ;;  %v3010_v30 = vcombine.high %v409_v25, %v417_v26  ;;  %v274_v17 = vld [vmem:[#allocation2 + $0xf0] sm:$0xff]  ;;  %v267_v18 = vld [vmem:[#allocation2 + $0xb8] sm:$0xff] }
  0xc6   : > { %1960 = vmatpush1.bf16.msra.mxu0 %v2879_v34  ;;  %2001 = vmatpush1.bf16.msra.mxu1 %v2881_v53  ;;  %v433_v34 = vld [vmem:[#allocation2 + $0x5e8] sm:$0xff]  ;;  %v3007_v53 = vcombine.low %v408_v23, %v416_v24  ;;  %v282_v24 = vld [vmem:[#allocation2 + $0x130] sm:$0xff] }
  0xc7   : > { %1961 = vmatprep.subr.bf16.mxu0 %v2896_v35  ;;  %2002 = vmatprep.subr.bf16.mxu1 %v2898_v36  ;;  %v3009_v35 = vcombine.low %v409_v25, %v417_v26  ;;  %v3024_v36 = vcombine.high %v424_v31, %v432_v32  ;;  %v3026_v37 = vcombine.high %v425_v33, %v433_v34  ;;  %v290_v25 = vld [vmem:[#allocation2 + $0x170] sm:$0xff]  ;;  %v3528_v26 = vld.sshfl [vmem:[%s3508_s6] sm:$0x33 pattern:$0x76325410]  ;;  %s228_s6 = sand.u32 1, %s3322_s16  }
  0xc8   : > { %s2834_s10 = sshll.u32 %s228_s6, 9  ;;  %s3777_s23 = scalar_lea.sflag [#allocation4], %s228_s6 }
  0xc9   : > { %s3636_s13 = scalar_lea.vmem [#allocation5], %s2834_s10  ;;  %s3254_s10 = scalar_lea.vmem %s3253_s5, 16384 }
  0xca   : > { %1962 = vmatpush1.bf16.msra.mxu0 %v2895_v41  ;;  %2003 = vmatpush1.bf16.msra.mxu1 %v2897_v42  ;;  %v449_v41 = vld [vmem:[#allocation2 + $0x668] sm:$0xff]  ;;  %v3023_v42 = vcombine.low %v424_v31, %v432_v32  ;;  %v2884_v31 = vcombine.high %v282_v24, %v290_v25  ;;  %s2733_s11 = sshll.u32 %s3636_s13, 4  ;;  %s3767_s11 = int_to_ptr.vmem [resolvable:$true] %s2733_s11 }
  0xcb   : > { %1963 = vmatprep.subr.bf16.mxu0 %v2912_v43  ;;  %2004 = vmatprep.subr.bf16.mxu1 %v2914_v44  ;;  %v3025_v43 = vcombine.low %v425_v33, %v433_v34  ;;  %v3040_v44 = vcombine.high %v440_v38, %v448_v39  ;;  %v3042_v45 = vcombine.high %v441_v40, %v449_v41  ;;  %v298_v33 = vld [vmem:[#allocation2 + $0x1b0] sm:$0xff]  ;;  %s3248_s28 = scalar_lea.vmem %s3767_s11, 8192  ;;  %p3255_p5 = scmp.lt.s32.totalorder %s3767_s11, %s3253_s5 }
  0xcc   : > { %v306_v34 = vld [vmem:[#allocation2 + $0x1f0] sm:$0xff]  ;;  %p3249_p10 = scmp.ne.s32.totalorder %s3767_s11, %s3248_s28  ;;  %p3256_p6 = scmp.lt.s32.totalorder %s3254_s10, %s3248_s28 }
  0xce   : > { %1964 = vmatpush1.bf16.msra.mxu0 %v2911_v49  ;;  %2005 = vmatpush1.bf16.msra.mxu1 %v2913_v50  ;;  %v465_v49 = vld [vmem:[#allocation2 + $0x6e8] sm:$0xff]  ;;  %v3039_v50 = vcombine.low %v440_v38, %v448_v39  ;;  %v2900_v38 = vcombine.high %v298_v33, %v306_v34  ;;  %p3250_p0 = pnand %p3249_p10, %p3846_p12  ;;  %p3257_p7 = por %p3256_p6, %p3255_p5 }
  0xcf   : > { %1965 = vmatprep.subr.bf16.mxu0 %v2928_v51  ;;  %2006 = vmatprep.subr.bf16.mxu1 %v2930_v52  ;;  %v3041_v51 = vcombine.low %v441_v40, %v449_v41  ;;  %v3056_v52 = vcombine.high %v456_v46, %v464_v47  ;;  %v3058_v54 = vcombine.high %v457_v48, %v465_v49  ;;  %v314_v40 = vld [vmem:[#allocation2 + $0x230] sm:$0xff] }
  0xd0   : > { %v322_v41 = vld [vmem:[#allocation2 + $0x270] sm:$0xff]  ;;  %p3251_p2 = pneg %p3250_p0 }
  0xd2   : > { %1966 = vmatpush1.bf16.msra.mxu0 %v2927_v59  ;;  %2007 = vmatpush1.bf16.msra.mxu1 %v2929_v60  ;;  %v481_v59 = vld [vmem:[#allocation2 + $0x768] sm:$0xff]  ;;  %v3055_v60 = vcombine.low %v456_v46, %v464_v47  ;;  %v2916_v46 = vcombine.high %v314_v40, %v322_v41  ;;  %v330_v47 = vld [vmem:[#allocation2 + $0x2b0] sm:$0xff]  ;;  %p3258_p9 = pnand %p3257_p7, %p3251_p2 }
  0xd3   : > { %1967 = vmatprep.subr.bf16.mxu0 %v2944_v61  ;;  %2008 = vmatprep.subr.bf16.mxu1 %v2946_v62  ;;  %v3057_v61 = vcombine.low %v457_v48, %v465_v49  ;;  %v3072_v62 = vcombine.high %v472_v55, %v480_v56  ;;  %v3074_v63 = vcombine.high %v473_v58, %v481_v59  ;;  %v338_v48 = vld [vmem:[#allocation2 + $0x2f0] sm:$0xff]  ;;  %v331_v49 = vld [vmem:[#allocation2 + $0x2b8] sm:$0xff] }
  0xd6   : > { %1968 = vmatpush1.bf16.msra.mxu0 %v2943_v3  ;;  %2009 = vmatpush1.bf16.msra.mxu1 %v2945_v4  ;;  %v497_v3 = vld [vmem:[#allocation2 + $0x7e8] sm:$0xff]  ;;  %v3071_v4 = vcombine.low %v472_v55, %v480_v56  ;;  %v346_v56 = vld [vmem:[#allocation2 + $0x330] sm:$0xff] }
  0xd7   : > { %1969 = vmatprep.subr.bf16.mxu0 %v2960_v5  ;;  %2010 = vmatprep.subr.bf16.mxu1 %v2962_v6  ;;  %v3073_v5 = vcombine.low %v473_v58, %v481_v59  ;;  %v3088_v6 = vcombine.high %v488_v0, %v496_v1  ;;  %v3090_v7 = vcombine.high %v489_v2, %v497_v3  ;;  %v354_v58 = vld [vmem:[#allocation2 + $0x370] sm:$0xff]  ;;  %v347_v59 = vld [vmem:[#allocation2 + $0x338] sm:$0xff] }
  0xda   : > { %1970 = vmatpush1.bf16.msra.mxu0 %v2959_v11  ;;  %2011 = vmatpush1.bf16.msra.mxu1 %v2961_v12  ;;  %v259_v11 = vld [vmem:[#allocation2 + $0x78] sm:$0xff]  ;;  %v3087_v12 = vcombine.low %v488_v0, %v496_v1  ;;  %v362_v1 = vld [vmem:[#allocation2 + $0x3b0] sm:$0xff] }
  0xdb   : > { %1971 = vmatprep.subr.bf16.mxu0 %v2976_v13  ;;  %2012 = vmatprep.subr.bf16.mxu1 %v2978_v14  ;;  %v3089_v13 = vcombine.low %v489_v2, %v497_v3  ;;  %v2852_v14 = vcombine.high %v250_v8, %v258_v9  ;;  %v2854_v15 = vcombine.high %v251_v10, %v259_v11  ;;  %v370_v2 = vld [vmem:[#allocation2 + $0x3f0] sm:$0xff]  ;;  %v363_v3 = vld [vmem:[#allocation2 + $0x3b8] sm:$0xff] }
  0xde   : > { %1972 = vmatpush1.bf16.msra.mxu0 %v2975_v19  ;;  %2013 = vmatpush1.bf16.msra.mxu1 %v2977_v20  ;;  %v275_v19 = vld [vmem:[#allocation2 + $0xf8] sm:$0xff]  ;;  %v2851_v20 = vcombine.low %v250_v8, %v258_v9  ;;  %v378_v9 = vld [vmem:[#allocation2 + $0x430] sm:$0xff] }
  0xdf   : > { %1973 = vmatprep.subr.bf16.mxu0 %v2992_v21  ;;  %2014 = vmatprep.subr.bf16.mxu1 %v2994_v22  ;;  %v2853_v21 = vcombine.low %v251_v10, %v259_v11  ;;  %v2868_v22 = vcombine.high %v266_v16, %v274_v17  ;;  %v2870_v23 = vcombine.high %v267_v18, %v275_v19  ;;  %v386_v10 = vld [vmem:[#allocation2 + $0x470] sm:$0xff]  ;;  %v379_v11 = vld [vmem:[#allocation2 + $0x438] sm:$0xff] }
  0xe2   : > { %1974 = vmatpush1.bf16.msra.mxu0 %v2991_v27  ;;  %2015 = vmatpush1.bf16.msra.mxu1 %v2993_v28  ;;  %v283_v27 = vld [vmem:[#allocation2 + $0x138] sm:$0xff] }
  0xe3   : > { %1975 = vmatprep.subr.bf16.mxu0 %v3008_v29  ;;  %2016 = vmatprep.subr.bf16.mxu1 %v3010_v30  ;;  %v291_v28 = vld [vmem:[#allocation2 + $0x178] sm:$0xff]  ;;  %v2867_v29 = vcombine.low %v266_v16, %v274_v17  ;;  %v2869_v30 = vcombine.low %v267_v18, %v275_v19  ;;  %v2980_v16 = vcombine.high %v378_v9, %v386_v10  ;;  %v394_v18 = vld [vmem:[#allocation2 + $0x4b0] sm:$0xff] }
  0xe4   : > { %v2886_v32 = vcombine.high %v283_v27, %v291_v28  ;;  %v402_v19 = vld [vmem:[#allocation2 + $0x4f0] sm:$0xff] }
  0xe6   : > { %1976 = vmatpush1.bf16.msra.mxu0 %v3007_v53  ;;  %2017 = vmatpush1.bf16.msra.mxu1 %v3009_v35  ;;  %v299_v53 = vld [vmem:[#allocation2 + $0x1b8] sm:$0xff] }
  0xe7   : > { %1977 = vmatprep.subr.bf16.mxu0 %v3024_v36  ;;  %2018 = vmatprep.subr.bf16.mxu1 %v3026_v37  ;;  %v307_v35 = vld [vmem:[#allocation2 + $0x1f8] sm:$0xff]  ;;  %v2883_v36 = vcombine.low %v282_v24, %v290_v25  ;;  %v2885_v37 = vcombine.low %v283_v27, %v291_v28  ;;  %v2996_v24 = vcombine.high %v394_v18, %v402_v19  ;;  %v410_v27 = vld [vmem:[#allocation2 + $0x530] sm:$0xff] }
  0xe8   : > { %v2902_v39 = vcombine.high %v299_v53, %v307_v35  ;;  %v418_v28 = vld [vmem:[#allocation2 + $0x570] sm:$0xff] }
  0xea   : > { %1978 = vmatpush1.bf16.msra.mxu0 %v3023_v42  ;;  %2019 = vmatpush1.bf16.msra.mxu1 %v3025_v43  ;;  %v315_v42 = vld [vmem:[#allocation2 + $0x238] sm:$0xff] }
  0xeb   : > { %1979 = vmatprep.subr.bf16.mxu0 %v3040_v44  ;;  %2020 = vmatprep.subr.bf16.mxu1 %v3042_v45  ;;  %v323_v43 = vld [vmem:[#allocation2 + $0x278] sm:$0xff]  ;;  %v2899_v44 = vcombine.low %v298_v33, %v306_v34  ;;  %v2901_v45 = vcombine.low %v299_v53, %v307_v35  ;;  %v3012_v33 = vcombine.high %v410_v27, %v418_v28  ;;  %v426_v53 = vld [vmem:[#allocation2 + $0x5b0] sm:$0xff] }
  0xec   : > { %v434_v35 = vld [vmem:[#allocation2 + $0x5f0] sm:$0xff] }
  0xee   : > { %1980 = vmatpush1.bf16.msra.mxu0 %v3039_v50  ;;  %2021 = vmatpush1.bf16.msra.mxu1 %v3041_v51  ;;  %v339_v50 = vld [vmem:[#allocation2 + $0x2f8] sm:$0xff]  ;;  %v2915_v51 = vcombine.low %v314_v40, %v322_v41  ;;  %v3028_v40 = vcombine.high %v426_v53, %v434_v35 }
  0xef   : > { %1981 = vmatprep.subr.bf16.mxu0 %v3056_v52  ;;  %2022 = vmatprep.subr.bf16.mxu1 %v3058_v54  ;;  %v2917_v52 = vcombine.low %v315_v42, %v323_v43  ;;  %v2932_v54 = vcombine.high %v330_v47, %v338_v48  ;;  %v2934_v55 = vcombine.high %v331_v49, %v339_v50 }
  0xf2   : > { %1982 = vmatpush1.bf16.msra.mxu0 %v3055_v60  ;;  %2023 = vmatpush1.bf16.msra.mxu1 %v3057_v61  ;;  %v355_v60 = vld [vmem:[#allocation2 + $0x378] sm:$0xff]  ;;  %v2931_v61 = vcombine.low %v330_v47, %v338_v48 }
  0xf3   : > { %1983 = vmatprep.subr.bf16.mxu0 %v3072_v62  ;;  %2024 = vmatprep.subr.bf16.mxu1 %v3074_v63  ;;  %v2933_v62 = vcombine.low %v331_v49, %v339_v50  ;;  %v2948_v63 = vcombine.high %v346_v56, %v354_v58  ;;  %v2950_v0 = vcombine.high %v347_v59, %v355_v60  ;;  %v458_v49 = vld [vmem:[#allocation2 + $0x6b0] sm:$0xff] }
  0xf4   : > { %v466_v50 = vld [vmem:[#allocation2 + $0x6f0] sm:$0xff] }
  0xf6   : > { %1984 = vmatpush1.bf16.msra.mxu0 %v3071_v4  ;;  %2025 = vmatpush1.bf16.msra.mxu1 %v3073_v5  ;;  %v371_v4 = vld [vmem:[#allocation2 + $0x3f8] sm:$0xff]  ;;  %v2947_v5 = vcombine.low %v346_v56, %v354_v58  ;;  %v3060_v56 = vcombine.high %v458_v49, %v466_v50 }
  0xf7   : > { %1985 = vmatprep.subr.bf16.mxu0 %v3088_v6  ;;  %2026 = vmatprep.subr.bf16.mxu1 %v3090_v7  ;;  %v2949_v6 = vcombine.low %v347_v59, %v355_v60  ;;  %v2964_v7 = vcombine.high %v362_v1, %v370_v2  ;;  %v2966_v8 = vcombine.high %v363_v3, %v371_v4  ;;  %v474_v59 = vld [vmem:[#allocation2 + $0x730] sm:$0xff] }
  0xf8   : > { %v482_v60 = vld [vmem:[#allocation2 + $0x770] sm:$0xff] }
  0xfa   : > { %1986 = vmatpush1.bf16.msra.mxu0 %v3087_v12  ;;  %2027 = vmatpush1.bf16.msra.mxu1 %v3089_v13  ;;  %v387_v12 = vld [vmem:[#allocation2 + $0x478] sm:$0xff]  ;;  %v3351_v13 = vmov 0  }
  0xfb   : > { %2037 = vmatprep.subr.bf16.mxu0 %v2852_v14  ;;  %2078 = vmatprep.subr.bf16.mxu1 %v2854_v15  ;;  %v2963_v14 = vcombine.low %v362_v1, %v370_v2  ;;  %v2965_v15 = vcombine.low %v363_v3, %v371_v4  ;;  %v2982_v17 = vcombine.high %v379_v11, %v387_v12  ;;  %v490_v3 = vld [vmem:[#allocation2 + $0x7b0] sm:$0xff] }
  0xfc   : > { %3215 = vset.pattern.permute.xlu0 %v3351_v13  ;;  %3216 = vset.pattern.permute.xlu1 %v3351_v13  ;;  %v3076_v1 = vcombine.high %v474_v59, %v482_v60  ;;  %v498_v4 = vld [vmem:[#allocation2 + $0x7f0] sm:$0xff] }
  0xfd   : > { %1988 = vmatmul.mubr.bf16.vlgmr.msra.gmra.mrb[8].mxu0 %v3528_v26  ;;  %2029 = vmatmul.mubr.bf16.vlgmr.msra.gmra.mrb[8].mxu1 %v3528_v26 }
  0xfe   : > { %2038 = vmatpush1.bf16.msra.mxu0 %v2851_v20  ;;  %2079 = vmatpush1.bf16.msra.mxu1 %v2853_v21  ;;  %v395_v20 = vld [vmem:[#allocation2 + $0x4b8] sm:$0xff] }
  0xff   : > { %2039 = vmatprep.subr.bf16.mxu0 %v2868_v22  ;;  %2080 = vmatprep.subr.bf16.mxu1 %v2870_v23  ;;  %v403_v21 = vld [vmem:[#allocation2 + $0x4f8] sm:$0xff]  ;;  %v2979_v22 = vcombine.low %v378_v9, %v386_v10  ;;  %v2981_v23 = vcombine.low %v379_v11, %v387_v12  ;;  %v3092_v9 = vcombine.high %v490_v3, %v498_v4 }
 0x100   : > { %2069 = vmatprep.mubr.bf16.mxu0 %v3515_v57  ;;  %2110 = vmatprep.mubr.bf16.mxu1 %v3515_v57  ;;  %v2918_v57 = vcombine.high %v315_v42, %v323_v43  ;;  %v2998_v25 = vcombine.high %v395_v20, %v403_v21  ;;  %v442_v42 = vld [vmem:[#allocation2 + $0x630] sm:$0xff]  ;;  %v3091_v11 = vcombine.low %v490_v3, %v498_v4 }
 0x101   : > { %v450_v43 = vld [vmem:[#allocation2 + $0x670] sm:$0xff] }
 0x102   : > { %2040 = vmatpush1.bf16.msra.mxu0 %v2867_v29  ;;  %2081 = vmatpush1.bf16.msra.mxu1 %v2869_v30  ;;  %v411_v29 = vld [vmem:[#allocation2 + $0x538] sm:$0xff]  ;;  %v3044_v47 = vcombine.high %v442_v42, %v450_v43 }
 0x103   : > { %2041 = vmatprep.subr.bf16.mxu0 %v2884_v31  ;;  %2082 = vmatprep.subr.bf16.mxu1 %v2886_v32  ;;  %v419_v30 = vld [vmem:[#allocation2 + $0x578] sm:$0xff]  ;;  %v2995_v31 = vcombine.low %v394_v18, %v402_v19  ;;  %v2997_v32 = vcombine.low %v395_v20, %v403_v21 }
 0x104   : > { %v3014_v34 = vcombine.high %v411_v29, %v419_v30 }
 0x106   : > { %2042 = vmatpush1.bf16.msra.mxu0 %v2883_v36  ;;  %2083 = vmatpush1.bf16.msra.mxu1 %v2885_v37  ;;  %v427_v36 = vld [vmem:[#allocation2 + $0x5b8] sm:$0xff] }
 0x107   : > { %2043 = vmatprep.subr.bf16.mxu0 %v2900_v38  ;;  %2084 = vmatprep.subr.bf16.mxu1 %v2902_v39  ;;  %v435_v37 = vld [vmem:[#allocation2 + $0x5f8] sm:$0xff]  ;;  %v3011_v38 = vcombine.low %v410_v27, %v418_v28  ;;  %v3013_v39 = vcombine.low %v411_v29, %v419_v30  ;;  %v3546_v28 = vld [vmem:[%s3830_s1] sm:$0xff]   ;;  %v3558_v29 = vld [vmem:[%s3830_s1 + $0x8] sm:$0xff]  }
 0x108   : > { %v3030_v41 = vcombine.high %v427_v36, %v435_v37 }
 0x10a   : > { %2044 = vmatpush1.bf16.msra.mxu0 %v2899_v44  ;;  %2085 = vmatpush1.bf16.msra.mxu1 %v2901_v45  ;;  %v443_v44 = vld [vmem:[#allocation2 + $0x638] sm:$0xff] }
 0x10b   : > { %2045 = vmatprep.subr.bf16.mxu0 %v2916_v46  ;;  %2086 = vmatprep.subr.bf16.mxu1 %v2918_v57  ;;  %v451_v45 = vld [vmem:[#allocation2 + $0x678] sm:$0xff]  ;;  %v3027_v46 = vcombine.low %v426_v53, %v434_v35  ;;  %v3029_v57 = vcombine.low %v427_v36, %v435_v37 }
 0x10c   : > { %v3046_v48 = vcombine.high %v443_v44, %v451_v45 }
 0x10e   : > { %2046 = vmatpush1.bf16.msra.mxu0 %v2915_v51  ;;  %2087 = vmatpush1.bf16.msra.mxu1 %v2917_v52  ;;  %v459_v51 = vld [vmem:[#allocation2 + $0x6b8] sm:$0xff] }
 0x10f   : > { %2047 = vmatprep.subr.bf16.mxu0 %v2932_v54  ;;  %2088 = vmatprep.subr.bf16.mxu1 %v2934_v55  ;;  %v467_v52 = vld [vmem:[#allocation2 + $0x6f8] sm:$0xff]  ;;  %v3043_v54 = vcombine.low %v442_v42, %v450_v43  ;;  %v3045_v55 = vcombine.low %v443_v44, %v451_v45  ;;  %v2139_v43 = vld [vmem:[%s3831_s2] sm:$0xff]  ;;  %v2141_v44 = vld [vmem:[%s3831_s2 + $0x10] sm:$0xff] }
 0x110   : > { %v3062_v58 = vcombine.high %v459_v51, %v467_v52  ;;  %2145 = vperm.xlu0 %3215, %v2139_v43   ;;  %v2140_v45 = vld [vmem:[%s3831_s2 + $0x8] sm:$0xff]  ;;  %2155 = vperm.xlu1 %3216, %v2141_v44  }
 0x112   : > { %2048 = vmatpush1.bf16.msra.mxu0 %v2931_v61  ;;  %2089 = vmatpush1.bf16.msra.mxu1 %v2933_v62  ;;  %v475_v61 = vld [vmem:[#allocation2 + $0x738] sm:$0xff] }
 0x113   : > { %2049 = vmatprep.subr.bf16.mxu0 %v2948_v63  ;;  %2090 = vmatprep.subr.bf16.mxu1 %v2950_v0  ;;  %v483_v62 = vld [vmem:[#allocation2 + $0x778] sm:$0xff]  ;;  %v3059_v63 = vcombine.low %v458_v49, %v466_v50  ;;  %v3061_v0 = vcombine.low %v459_v51, %v467_v52 }
 0x114   : > { %v3078_v2 = vcombine.high %v475_v61, %v483_v62  ;;  %2150 = vperm.xlu0 %3215, %v2140_v45  }
 0x116   : > { %2050 = vmatpush1.bf16.msra.mxu0 %v2947_v5  ;;  %2091 = vmatpush1.bf16.msra.mxu1 %v2949_v6  ;;  %v491_v5 = vld [vmem:[#allocation2 + $0x7b8] sm:$0xff] }
 0x117   : > { %2051 = vmatprep.subr.bf16.mxu0 %v2964_v7  ;;  %2092 = vmatprep.subr.bf16.mxu1 %v2966_v8  ;;  %v499_v6 = vld [vmem:[#allocation2 + $0x7f8] sm:$0xff]  ;;  %v3075_v7 = vcombine.low %v474_v59, %v482_v60  ;;  %v3077_v8 = vcombine.low %v475_v61, %v483_v62 }
 0x118   : > { %v3094_v10 = vcombine.high %v491_v5, %v499_v6  ;;  %v3093_v12 = vcombine.low %v491_v5, %v499_v6 }
 0x11a   : > { %2052 = vmatpush1.bf16.msra.mxu0 %v2963_v14  ;;  %2093 = vmatpush1.bf16.msra.mxu1 %v2965_v15 }
 0x11b   : > { %2053 = vmatprep.subr.bf16.mxu0 %v2980_v16  ;;  %2094 = vmatprep.subr.bf16.mxu1 %v2982_v17 }
 0x11e   : > { %2054 = vmatpush1.bf16.msra.mxu0 %v2979_v22  ;;  %2095 = vmatpush1.bf16.msra.mxu1 %v2981_v23 }
 0x11f   : > { %2055 = vmatprep.subr.bf16.mxu0 %v2996_v24  ;;  %2096 = vmatprep.subr.bf16.mxu1 %v2998_v25 }
 0x122   : > { %2056 = vmatpush1.bf16.msra.mxu0 %v2995_v31  ;;  %2097 = vmatpush1.bf16.msra.mxu1 %v2997_v32 }
 0x123   : > { %2057 = vmatprep.subr.bf16.mxu0 %v3012_v33  ;;  %2098 = vmatprep.subr.bf16.mxu1 %v3014_v34 }
 0x126   : > { %2058 = vmatpush1.bf16.msra.mxu0 %v3011_v38  ;;  %2099 = vmatpush1.bf16.msra.mxu1 %v3013_v39 }
 0x127   : > { %2059 = vmatprep.subr.bf16.mxu0 %v3028_v40  ;;  %2100 = vmatprep.subr.bf16.mxu1 %v3030_v41 }
 0x12a   : > { %2060 = vmatpush1.bf16.msra.mxu0 %v3027_v46  ;;  %2101 = vmatpush1.bf16.msra.mxu1 %v3029_v57  ;;  %v2142_v46 = vld [vmem:[%s3831_s2 + $0x18] sm:$0xff] }
 0x12b   : > { %2061 = vmatprep.subr.bf16.mxu0 %v3044_v47  ;;  %2102 = vmatprep.subr.bf16.mxu1 %v3046_v48 }
 0x12c   : > { %2160 = vperm.xlu1 %3216, %v2142_v46  }
 0x12e   : > { %2062 = vmatpush1.bf16.msra.mxu0 %v3043_v54  ;;  %2103 = vmatpush1.bf16.msra.mxu1 %v3045_v55 }
 0x12f   : > { %2063 = vmatprep.subr.bf16.mxu0 %v3060_v56  ;;  %2104 = vmatprep.subr.bf16.mxu1 %v3062_v58 }
 0x132   : > { %2064 = vmatpush1.bf16.msra.mxu0 %v3059_v63  ;;  %2105 = vmatpush1.bf16.msra.mxu1 %v3061_v0 }
 0x133   : > { %2065 = vmatprep.subr.bf16.mxu0 %v3076_v1  ;;  %2106 = vmatprep.subr.bf16.mxu1 %v3078_v2 }
 0x136   : > { %2066 = vmatpush1.bf16.msra.mxu0 %v3075_v7  ;;  %2107 = vmatpush1.bf16.msra.mxu1 %v3077_v8 }
 0x137   : > { %2067 = vmatprep.subr.bf16.mxu0 %v3092_v9  ;;  %2108 = vmatprep.subr.bf16.mxu1 %v3094_v10 }
 0x13a   : > { %2068 = vmatpush1.bf16.msra.mxu0 %v3091_v11  ;;  %2109 = vmatpush1.bf16.msra.mxu1 %v3093_v12 }
 0x13d   : > { %2070 = vmatmul.mubr.bf16.vlgmr.msra.gmra.mrb[12].mxu0 %v3528_v26  ;;  %2111 = vmatmul.mubr.bf16.vlgmr.msra.gmra.mrb[12].mxu1 %v3528_v26 }
 0x13e   : > { %2261 = vmatprep.mubr.bf16.mxu0 %v3351_v13  ;;  %2314 = vmatprep.mubr.bf16.mxu1 %v3351_v13 }
 0x150   : > { %v1825_v14 = vpop.f32.mrb[0].mxu0  ;;  %v1866_v16 = vpop.f32.mrb[0].mxu1 }
 0x151   : > { %v2123_v15 = vpack.c.bf16 %v1825_v14, %v1825_v14  ;;  %v1827_v17 = vpop.f32.mrb[1].mxu0  ;;  %v2125_v18 = vpack.c.bf16 %v1866_v16, %v1866_v16  ;;  %v1868_v20 = vpop.f32.mrb[1].mxu1 }
 0x152   : > { %v2124_v19 = vpack.c.bf16 %v1827_v17, %v1827_v17  ;;  %v1829_v21 = vpop.f32.mrb[2].mxu0  ;;  %v2126_v23 = vpack.c.bf16 %v1868_v20, %v1868_v20  ;;  %v1870_v24 = vpop.f32.mrb[2].mxu1 }
 0x153   : > { %v2182_v22 = vsel %vm2180_vm0, %v2123_v15, 0  ;;  %v1830_v25 = vpop.f32.mrb[3].mxu0  ;;  %v2188_v26 = vsel %vm2180_vm0, %v2125_v18, 0  ;;  %v1871_v27 = vpop.f32.mrb[3].mxu1 }
 0x154   : > { %3097 = vmatprep.subr.msk.bf16.mxu0 %vm2180_vm0, %v2124_v19  ;;  %3100 = vmatprep.subr.msk.bf16.mxu1 %vm2180_vm0, %v2126_v23 }
 0x155   : > { %2230 = vmatpush1.bf16.msra.mxu0 %v2182_v22  ;;  %2283 = vmatpush1.bf16.msra.mxu1 %v2188_v26 }
 0x158   : > { %3098 = vmatmul.mubr.msk.bf16.vlgmr.msra.gmra.mrb[16].mxu0 %vm2173_vm1, %v3546_v28  ;;  %3101 = vmatmul.mubr.msk.bf16.vlgmr.msra.gmra.mrb[16].mxu1 %vm2173_vm1, %v3546_v28 }
 0x159   : > { %2271 = vmatprep.mubr.bf16.mxu0 %v3351_v13  ;;  %2324 = vmatprep.mubr.bf16.mxu1 %v3351_v13 }
 0x160   : > { %3099 = vmatmul.mubr.msk.bf16.gmra.mrb[20].mxu0 %vm2173_vm1, %v3558_v29  ;;  %3102 = vmatmul.mubr.msk.bf16.gmra.mrb[20].mxu1 %vm2173_vm1, %v3558_v29 }
 0x161   : > { %2367 = vmatprep.mubr.bf16.mxu0 %v3351_v13  ;;  %2420 = vmatprep.mubr.bf16.mxu1 %v3351_v13 }
 0x18f   : > { %v3624_v12 = vpop.permute.xlu0 %2145  ;;  %v3629_v14 = vpop.permute.xlu1 %2155 }
 0x190   : > { %v1907_v30 = vpop.f32.mrb[4].mxu0  ;;  %v1948_v32 = vpop.f32.mrb[4].mxu1 }
 0x191   : > { %v2127_v31 = vpack.c.bf16 %v1907_v30, %v1907_v30  ;;  %v1909_v33 = vpop.f32.mrb[5].mxu0  ;;  %v2129_v34 = vpack.c.bf16 %v1948_v32, %v1948_v32  ;;  %v1950_v35 = vpop.f32.mrb[5].mxu1 }
 0x192   : > { %v2128_v53 = vpack.c.bf16 %v1909_v33, %v1909_v33  ;;  %v1911_v36 = vpop.f32.mrb[6].mxu0  ;;  %v2130_v38 = vpack.c.bf16 %v1950_v35, %v1950_v35  ;;  %v1952_v39 = vpop.f32.mrb[6].mxu1 }
 0x193   : > { %v2194_v37 = vsel %vm2180_vm0, %v2127_v31, 0  ;;  %v1912_v40 = vpop.f32.mrb[7].mxu0  ;;  %v2200_v41 = vsel %vm2180_vm0, %v2129_v34, 0  ;;  %v1953_v42 = vpop.f32.mrb[7].mxu1 }
 0x194   : > { %3103 = vmatprep.subr.msk.bf16.mxu0 %vm2180_vm0, %v2128_v53  ;;  %3106 = vmatprep.subr.msk.bf16.mxu1 %vm2180_vm0, %v2130_v38  ;;  %v3631_v16 = vpop.permute.xlu0 %2150 }
 0x195   : > { %2336 = vmatpush1.bf16.msra.mxu0 %v2194_v37  ;;  %2389 = vmatpush1.bf16.msra.mxu1 %v2200_v41 }
 0x198   : > { %3104 = vmatmul.mubr.msk.bf16.vlgmr.msra.gmra.mrb[24].mxu0 %vm2173_vm1, %v3546_v28  ;;  %3107 = vmatmul.mubr.msk.bf16.vlgmr.msra.gmra.mrb[24].mxu1 %vm2173_vm1, %v3546_v28 }
 0x199   : > { %2377 = vmatprep.mubr.bf16.mxu0 %v3351_v13  ;;  %2430 = vmatprep.mubr.bf16.mxu1 %v3351_v13 }
 0x1a0   : > { %3105 = vmatmul.mubr.msk.bf16.gmra.mrb[28].mxu0 %vm2173_vm1, %v3558_v29  ;;  %3108 = vmatmul.mubr.msk.bf16.gmra.mrb[28].mxu1 %vm2173_vm1, %v3558_v29 }
 0x1a1   : > { %2473 = vmatprep.mubr.bf16.mxu0 %v3351_v13  ;;  %2526 = vmatprep.mubr.bf16.mxu1 %v3351_v13 }
 0x1ab   : > { %v3651_v32 = vpop.permute.xlu1 %2160 }
 0x1d0   : > { %v1989_v57 = vpop.f32.mrb[8].mxu0  ;;  %v2030_v48 = vpop.f32.mrb[8].mxu1 }
 0x1d1   : > { %v2131_v47 = vpack.c.bf16 %v1989_v57, %v1989_v57  ;;  %v1991_v49 = vpop.f32.mrb[9].mxu0  ;;  %v2133_v50 = vpack.c.bf16 %v2030_v48, %v2030_v48  ;;  %v2032_v52 = vpop.f32.mrb[9].mxu1 }
 0x1d2   : > { %v2132_v51 = vpack.c.bf16 %v1991_v49, %v1991_v49  ;;  %v1993_v54 = vpop.f32.mrb[10].mxu0  ;;  %v2134_v56 = vpack.c.bf16 %v2032_v52, %v2032_v52  ;;  %v2034_v58 = vpop.f32.mrb[10].mxu1 }
 0x1d3   : > { %v2206_v55 = vsel %vm2180_vm0, %v2131_v47, 0  ;;  %v1994_v59 = vpop.f32.mrb[11].mxu0  ;;  %v2212_v60 = vsel %vm2180_vm0, %v2133_v50, 0  ;;  %v2035_v61 = vpop.f32.mrb[11].mxu1 }
 0x1d4   : > { %3109 = vmatprep.subr.msk.bf16.mxu0 %vm2180_vm0, %v2132_v51  ;;  %3112 = vmatprep.subr.msk.bf16.mxu1 %vm2180_vm0, %v2134_v56 }
 0x1d5   : > { %2442 = vmatpush1.bf16.msra.mxu0 %v2206_v55  ;;  %2495 = vmatpush1.bf16.msra.mxu1 %v2212_v60 }
 0x1d8   : > { %3110 = vmatmul.mubr.msk.bf16.vlgmr.msra.gmra.mrb[32].mxu0 %vm2173_vm1, %v3546_v28  ;;  %3113 = vmatmul.mubr.msk.bf16.vlgmr.msra.gmra.mrb[32].mxu1 %vm2173_vm1, %v3546_v28 }
 0x1d9   : > { %2483 = vmatprep.mubr.bf16.mxu0 %v3351_v13  ;;  %2536 = vmatprep.mubr.bf16.mxu1 %v3351_v13 }
 0x1e0   : > { %3111 = vmatmul.mubr.msk.bf16.gmra.mrb[36].mxu0 %vm2173_vm1, %v3558_v29  ;;  %3114 = vmatmul.mubr.msk.bf16.gmra.mrb[36].mxu1 %vm2173_vm1, %v3558_v29 }
 0x1e1   : > { %2579 = vmatprep.mubr.bf16.mxu0 %v3351_v13  ;;  %2632 = vmatprep.mubr.bf16.mxu1 %v3351_v13 }
 0x210   : > { %v2071_v62 = vpop.f32.mrb[12].mxu0  ;;  %v2112_v0 = vpop.f32.mrb[12].mxu1 }
 0x211   : > { %v2135_v63 = vpack.c.bf16 %v2071_v62, %v2071_v62  ;;  %v2073_v1 = vpop.f32.mrb[13].mxu0  ;;  %v2137_v2 = vpack.c.bf16 %v2112_v0, %v2112_v0  ;;  %v2114_v4 = vpop.f32.mrb[13].mxu1 }
 0x212   : > { %v2136_v3 = vpack.c.bf16 %v2073_v1, %v2073_v1  ;;  %v2075_v5 = vpop.f32.mrb[14].mxu0  ;;  %v2138_v7 = vpack.c.bf16 %v2114_v4, %v2114_v4  ;;  %v2116_v8 = vpop.f32.mrb[14].mxu1 }
 0x213   : > { %v2218_v6 = vsel %vm2180_vm0, %v2135_v63, 0  ;;  %v2076_v9 = vpop.f32.mrb[15].mxu0  ;;  %v2224_v10 = vsel %vm2180_vm0, %v2137_v2, 0  ;;  %v2117_v11 = vpop.f32.mrb[15].mxu1 }
 0x214   : > { %3115 = vmatprep.subr.msk.bf16.mxu0 %vm2180_vm0, %v2136_v3  ;;  %3118 = vmatprep.subr.msk.bf16.mxu1 %vm2180_vm0, %v2138_v7 }
 0x215   : > { %2548 = vmatpush1.bf16.msra.mxu0 %v2218_v6  ;;  %2601 = vmatpush1.bf16.msra.mxu1 %v2224_v10 }
 0x218   : > { %3116 = vmatmul.mubr.msk.bf16.vlgmr.msra.gmra.mrb[40].mxu0 %vm2173_vm1, %v3546_v28  ;;  %3119 = vmatmul.mubr.msk.bf16.vlgmr.msra.gmra.mrb[40].mxu1 %vm2173_vm1, %v3546_v28 }
 0x219   : > { %2589 = vmatprep.mubr.bf16.mxu0 %v3351_v13  ;;  %2642 = vmatprep.mubr.bf16.mxu1 %v3351_v13 }
 0x220   : > { %3117 = vmatmul.mubr.msk.bf16.gmra.mrb[44].mxu0 %vm2173_vm1, %v3558_v29  ;;  %3120 = vmatmul.mubr.msk.bf16.gmra.mrb[44].mxu1 %vm2173_vm1, %v3558_v29 }
 0x22b   : > { %v2263_v15 = vpop.f32.mrb[16].mxu0  ;;  %v2316_v18 = vpop.f32.mrb[16].mxu1 }
 0x22c   : > { %v2264_v17 = vadd.f32 %v2263_v15, %v3624_v12  ;;  %v2265_v13 = vpop.f32.mrb[17].mxu0  ;;  %v2317_v19 = vadd.f32 %v2316_v18, %v3624_v12  ;;  %v2318_v21 = vpop.f32.mrb[17].mxu1 }
 0x22d   : > { %v2266_v20 = vadd.f32 %v2265_v13, %v3624_v12  ;;  %v2267_v22 = vpop.f32.mrb[18].mxu0  ;;  %v2319_v23 = vadd.f32 %v2318_v21, %v3624_v12  ;;  %v2320_v24 = vpop.f32.mrb[18].mxu1 }
 0x22e   : > { %2653 = vst [vmem:[%s3636_s13] sm:$0xff] %v2264_v17  ;;  %v2268_v25 = vadd.f32 %v2267_v22, %v3631_v16  ;;  %v2269_v26 = vpop.f32.mrb[19].mxu0  ;;  %2655 = vst [vmem:[%s3636_s13 + $0x10] sm:$0xff] %v2317_v19  ;;  %v2321_v27 = vadd.f32 %v2320_v24, %v3631_v16  ;;  %v2322_v29 = vpop.f32.mrb[19].mxu1 }
 0x22f   : > { %2654 = vst [vmem:[%s3636_s13 + $0x8] sm:$0xff] %v2266_v20  ;;  %v2270_v28 = vadd.f32 %v2269_v26, %v3631_v16  ;;  %2656 = vst [vmem:[%s3636_s13 + $0x18] sm:$0xff] %v2319_v23  ;;  %v2323_v30 = vadd.f32 %v2322_v29, %v3631_v16 }
 0x230   : > { %2669 = vst [vmem:[%s3636_s13 + $0x80] sm:$0xff] %v2268_v25  ;;  %2671 = vst [vmem:[%s3636_s13 + $0x90] sm:$0xff] %v2321_v27 }
 0x231   : > { %2670 = vst [vmem:[%s3636_s13 + $0x88] sm:$0xff] %v2270_v28  ;;  %2672 = vst [vmem:[%s3636_s13 + $0x98] sm:$0xff] %v2323_v30 }
 0x233   : > { %v2273_v31 = vpop.f32.mrb[20].mxu0  ;;  %v2326_v34 = vpop.f32.mrb[20].mxu1 }
 0x234   : > { %v2274_v33 = vadd.f32 %v2273_v31, %v3629_v14  ;;  %v2275_v53 = vpop.f32.mrb[21].mxu0  ;;  %v2327_v35 = vadd.f32 %v2326_v34, %v3629_v14  ;;  %v2328_v37 = vpop.f32.mrb[21].mxu1 }
 0x235   : > { %v2276_v36 = vadd.f32 %v2275_v53, %v3629_v14  ;;  %v2277_v38 = vpop.f32.mrb[22].mxu0  ;;  %v2329_v39 = vadd.f32 %v2328_v37, %v3629_v14  ;;  %v2330_v40 = vpop.f32.mrb[22].mxu1 }
 0x236   : > { %2685 = vst [vmem:[%s3636_s13 + $0x100] sm:$0xff] %v2274_v33  ;;  %v2278_v41 = vadd.f32 %v2277_v38, %v3651_v32  ;;  %v2279_v42 = vpop.f32.mrb[23].mxu0  ;;  %2687 = vst [vmem:[%s3636_s13 + $0x110] sm:$0xff] %v2327_v35  ;;  %v2331_v43 = vadd.f32 %v2330_v40, %v3651_v32  ;;  %v2332_v45 = vpop.f32.mrb[23].mxu1 }
 0x237   : > { %2686 = vst [vmem:[%s3636_s13 + $0x108] sm:$0xff] %v2276_v36  ;;  %v2280_v44 = vadd.f32 %v2279_v42, %v3651_v32  ;;  %2688 = vst [vmem:[%s3636_s13 + $0x118] sm:$0xff] %v2329_v39  ;;  %v2333_v46 = vadd.f32 %v2332_v45, %v3651_v32 }
 0x238   : > { %2701 = vst [vmem:[%s3636_s13 + $0x180] sm:$0xff] %v2278_v41  ;;  %2703 = vst [vmem:[%s3636_s13 + $0x190] sm:$0xff] %v2331_v43 }
 0x239   : > { %2702 = vst [vmem:[%s3636_s13 + $0x188] sm:$0xff] %v2280_v44  ;;  %2704 = vst [vmem:[%s3636_s13 + $0x198] sm:$0xff] %v2333_v46 }
 0x26b   : > { %v2369_v57 = vpop.f32.mrb[24].mxu0  ;;  %v2422_v48 = vpop.f32.mrb[24].mxu1 }
 0x26c   : > { %v2370_v47 = vadd.f32 %v2369_v57, %v3624_v12  ;;  %v2371_v49 = vpop.f32.mrb[25].mxu0  ;;  %v2423_v50 = vadd.f32 %v2422_v48, %v3624_v12  ;;  %v2424_v52 = vpop.f32.mrb[25].mxu1 }
 0x26d   : > { %v2372_v51 = vadd.f32 %v2371_v49, %v3624_v12  ;;  %v2373_v54 = vpop.f32.mrb[26].mxu0  ;;  %v2425_v55 = vadd.f32 %v2424_v52, %v3624_v12  ;;  %v2426_v58 = vpop.f32.mrb[26].mxu1 }
 0x26e   : > { %2657 = vst [vmem:[%s3636_s13 + $0x20] sm:$0xff] %v2370_v47  ;;  %v2374_v56 = vadd.f32 %v2373_v54, %v3631_v16  ;;  %v2375_v59 = vpop.f32.mrb[27].mxu0  ;;  %2659 = vst [vmem:[%s3636_s13 + $0x30] sm:$0xff] %v2423_v50  ;;  %v2427_v60 = vadd.f32 %v2426_v58, %v3631_v16  ;;  %v2428_v62 = vpop.f32.mrb[27].mxu1 }
 0x26f   : > { %2658 = vst [vmem:[%s3636_s13 + $0x28] sm:$0xff] %v2372_v51  ;;  %v2376_v61 = vadd.f32 %v2375_v59, %v3631_v16  ;;  %2660 = vst [vmem:[%s3636_s13 + $0x38] sm:$0xff] %v2425_v55  ;;  %v2429_v63 = vadd.f32 %v2428_v62, %v3631_v16 }
 0x270   : > { %2673 = vst [vmem:[%s3636_s13 + $0xa0] sm:$0xff] %v2374_v56  ;;  %2675 = vst [vmem:[%s3636_s13 + $0xb0] sm:$0xff] %v2427_v60 }
 0x271   : > { %2674 = vst [vmem:[%s3636_s13 + $0xa8] sm:$0xff] %v2376_v61  ;;  %2676 = vst [vmem:[%s3636_s13 + $0xb8] sm:$0xff] %v2429_v63 }
 0x273   : > { %v2379_v0 = vpop.f32.mrb[28].mxu0  ;;  %v2432_v2 = vpop.f32.mrb[28].mxu1 }
 0x274   : > { %v2380_v1 = vadd.f32 %v2379_v0, %v3629_v14  ;;  %v2381_v3 = vpop.f32.mrb[29].mxu0  ;;  %v2433_v4 = vadd.f32 %v2432_v2, %v3629_v14  ;;  %v2434_v6 = vpop.f32.mrb[29].mxu1 }
 0x275   : > { %v2382_v5 = vadd.f32 %v2381_v3, %v3629_v14  ;;  %v2383_v7 = vpop.f32.mrb[30].mxu0  ;;  %v2435_v8 = vadd.f32 %v2434_v6, %v3629_v14  ;;  %v2436_v10 = vpop.f32.mrb[30].mxu1 }
 0x276   : > { %2689 = vst [vmem:[%s3636_s13 + $0x120] sm:$0xff] %v2380_v1  ;;  %v2384_v9 = vadd.f32 %v2383_v7, %v3651_v32  ;;  %v2385_v11 = vpop.f32.mrb[31].mxu0  ;;  %2691 = vst [vmem:[%s3636_s13 + $0x130] sm:$0xff] %v2433_v4  ;;  %v2437_v15 = vadd.f32 %v2436_v10, %v3651_v32  ;;  %v2438_v18 = vpop.f32.mrb[31].mxu1 }
 0x277   : > { %2690 = vst [vmem:[%s3636_s13 + $0x128] sm:$0xff] %v2382_v5  ;;  %v2386_v17 = vadd.f32 %v2385_v11, %v3651_v32  ;;  %2692 = vst [vmem:[%s3636_s13 + $0x138] sm:$0xff] %v2435_v8  ;;  %v2439_v13 = vadd.f32 %v2438_v18, %v3651_v32 }
 0x278   : > { %2705 = vst [vmem:[%s3636_s13 + $0x1a0] sm:$0xff] %v2384_v9  ;;  %2707 = vst [vmem:[%s3636_s13 + $0x1b0] sm:$0xff] %v2437_v15 }
 0x279   : > { %2706 = vst [vmem:[%s3636_s13 + $0x1a8] sm:$0xff] %v2386_v17  ;;  %2708 = vst [vmem:[%s3636_s13 + $0x1b8] sm:$0xff] %v2439_v13 }
 0x2ab   : > { %v2475_v19 = vpop.f32.mrb[32].mxu0  ;;  %v2528_v21 = vpop.f32.mrb[32].mxu1 }
 0x2ac   : > { %v2476_v20 = vadd.f32 %v2475_v19, %v3624_v12  ;;  %v2477_v22 = vpop.f32.mrb[33].mxu0  ;;  %v2529_v23 = vadd.f32 %v2528_v21, %v3624_v12  ;;  %v2530_v25 = vpop.f32.mrb[33].mxu1 }
 0x2ad   : > { %v2478_v24 = vadd.f32 %v2477_v22, %v3624_v12  ;;  %v2479_v26 = vpop.f32.mrb[34].mxu0  ;;  %v2531_v27 = vadd.f32 %v2530_v25, %v3624_v12  ;;  %v2532_v29 = vpop.f32.mrb[34].mxu1 }
 0x2ae   : > { %2661 = vst [vmem:[%s3636_s13 + $0x40] sm:$0xff] %v2476_v20  ;;  %v2480_v28 = vadd.f32 %v2479_v26, %v3631_v16  ;;  %v2481_v30 = vpop.f32.mrb[35].mxu0  ;;  %2663 = vst [vmem:[%s3636_s13 + $0x50] sm:$0xff] %v2529_v23  ;;  %v2533_v31 = vadd.f32 %v2532_v29, %v3631_v16  ;;  %v2534_v34 = vpop.f32.mrb[35].mxu1 }
 0x2af   : > { %2662 = vst [vmem:[%s3636_s13 + $0x48] sm:$0xff] %v2478_v24  ;;  %v2482_v33 = vadd.f32 %v2481_v30, %v3631_v16  ;;  %2664 = vst [vmem:[%s3636_s13 + $0x58] sm:$0xff] %v2531_v27  ;;  %v2535_v53 = vadd.f32 %v2534_v34, %v3631_v16 }
 0x2b0   : > { %2677 = vst [vmem:[%s3636_s13 + $0xc0] sm:$0xff] %v2480_v28  ;;  %2679 = vst [vmem:[%s3636_s13 + $0xd0] sm:$0xff] %v2533_v31 }
 0x2b1   : > { %2678 = vst [vmem:[%s3636_s13 + $0xc8] sm:$0xff] %v2482_v33  ;;  %2680 = vst [vmem:[%s3636_s13 + $0xd8] sm:$0xff] %v2535_v53 }
 0x2b3   : > { %v2485_v35 = vpop.f32.mrb[36].mxu0  ;;  %v2538_v37 = vpop.f32.mrb[36].mxu1 }
 0x2b4   : > { %v2486_v36 = vadd.f32 %v2485_v35, %v3629_v14  ;;  %v2487_v38 = vpop.f32.mrb[37].mxu0  ;;  %v2539_v39 = vadd.f32 %v2538_v37, %v3629_v14  ;;  %v2540_v41 = vpop.f32.mrb[37].mxu1 }
 0x2b5   : > { %v2488_v40 = vadd.f32 %v2487_v38, %v3629_v14  ;;  %v2489_v42 = vpop.f32.mrb[38].mxu0  ;;  %v2541_v43 = vadd.f32 %v2540_v41, %v3629_v14  ;;  %v2542_v45 = vpop.f32.mrb[38].mxu1 }
 0x2b6   : > { %2693 = vst [vmem:[%s3636_s13 + $0x140] sm:$0xff] %v2486_v36  ;;  %v2490_v44 = vadd.f32 %v2489_v42, %v3651_v32  ;;  %v2491_v46 = vpop.f32.mrb[39].mxu0  ;;  %2695 = vst [vmem:[%s3636_s13 + $0x150] sm:$0xff] %v2539_v39  ;;  %v2543_v57 = vadd.f32 %v2542_v45, %v3651_v32  ;;  %v2544_v48 = vpop.f32.mrb[39].mxu1 }
 0x2b7   : > { %2694 = vst [vmem:[%s3636_s13 + $0x148] sm:$0xff] %v2488_v40  ;;  %v2492_v47 = vadd.f32 %v2491_v46, %v3651_v32  ;;  %2696 = vst [vmem:[%s3636_s13 + $0x158] sm:$0xff] %v2541_v43  ;;  %v2545_v49 = vadd.f32 %v2544_v48, %v3651_v32 }
 0x2b8   : > { %2709 = vst [vmem:[%s3636_s13 + $0x1c0] sm:$0xff] %v2490_v44  ;;  %2711 = vst [vmem:[%s3636_s13 + $0x1d0] sm:$0xff] %v2543_v57 }
 0x2b9   : > { %2710 = vst [vmem:[%s3636_s13 + $0x1c8] sm:$0xff] %v2492_v47  ;;  %2712 = vst [vmem:[%s3636_s13 + $0x1d8] sm:$0xff] %v2545_v49 }
 0x2eb   : > { %v2581_v50 = vpop.f32.mrb[40].mxu0  ;;  %v2634_v52 = vpop.f32.mrb[40].mxu1 }
 0x2ec   : > { %v2582_v51 = vadd.f32 %v2581_v50, %v3624_v12  ;;  %v2583_v54 = vpop.f32.mrb[41].mxu0  ;;  %v2635_v55 = vadd.f32 %v2634_v52, %v3624_v12  ;;  %v2636_v58 = vpop.f32.mrb[41].mxu1 }
 0x2ed   : > { %v2584_v56 = vadd.f32 %v2583_v54, %v3624_v12  ;;  %v2585_v59 = vpop.f32.mrb[42].mxu0  ;;  %v2637_v60 = vadd.f32 %v2636_v58, %v3624_v12  ;;  %v2638_v62 = vpop.f32.mrb[42].mxu1 }
 0x2ee   : > { %2665 = vst [vmem:[%s3636_s13 + $0x60] sm:$0xff] %v2582_v51  ;;  %v2586_v61 = vadd.f32 %v2585_v59, %v3631_v16  ;;  %v2587_v63 = vpop.f32.mrb[43].mxu0  ;;  %2667 = vst [vmem:[%s3636_s13 + $0x70] sm:$0xff] %v2635_v55  ;;  %v2639_v0 = vadd.f32 %v2638_v62, %v3631_v16  ;;  %v2640_v2 = vpop.f32.mrb[43].mxu1 }
 0x2ef   : > { %2666 = vst [vmem:[%s3636_s13 + $0x68] sm:$0xff] %v2584_v56  ;;  %v2588_v1 = vadd.f32 %v2587_v63, %v3631_v16  ;;  %2668 = vst [vmem:[%s3636_s13 + $0x78] sm:$0xff] %v2637_v60  ;;  %v2641_v3 = vadd.f32 %v2640_v2, %v3631_v16 }
 0x2f0   : > { %2681 = vst [vmem:[%s3636_s13 + $0xe0] sm:$0xff] %v2586_v61  ;;  %2683 = vst [vmem:[%s3636_s13 + $0xf0] sm:$0xff] %v2639_v0 }
 0x2f1   : > { %2682 = vst [vmem:[%s3636_s13 + $0xe8] sm:$0xff] %v2588_v1  ;;  %2684 = vst [vmem:[%s3636_s13 + $0xf8] sm:$0xff] %v2641_v3 }
 0x2f3   : > { %v2591_v12 = vpop.f32.mrb[44].mxu0  ;;  %v2644_v5 = vpop.f32.mrb[44].mxu1 }
 0x2f4   : > { %v2592_v4 = vadd.f32 %v2591_v12, %v3629_v14  ;;  %v2593_v6 = vpop.f32.mrb[45].mxu0  ;;  %v2645_v7 = vadd.f32 %v2644_v5, %v3629_v14  ;;  %v2646_v16 = vpop.f32.mrb[45].mxu1 }
 0x2f5   : > { %v2594_v8 = vadd.f32 %v2593_v6, %v3629_v14  ;;  %v2595_v9 = vpop.f32.mrb[46].mxu0  ;;  %v2647_v10 = vadd.f32 %v2646_v16, %v3629_v14  ;;  %v2648_v15 = vpop.f32.mrb[46].mxu1 }
 0x2f6   : > { %2697 = vst [vmem:[%s3636_s13 + $0x160] sm:$0xff] %v2592_v4  ;;  %v2596_v11 = vadd.f32 %v2595_v9, %v3651_v32  ;;  %v2597_v17 = vpop.f32.mrb[47].mxu0  ;;  %2699 = vst [vmem:[%s3636_s13 + $0x170] sm:$0xff] %v2645_v7  ;;  %v2649_v18 = vadd.f32 %v2648_v15, %v3651_v32  ;;  %v2650_v19 = vpop.f32.mrb[47].mxu1 }
 0x2f7   : > { %2698 = vst [vmem:[%s3636_s13 + $0x168] sm:$0xff] %v2594_v8  ;;  %v2598_v13 = vadd.f32 %v2597_v17, %v3651_v32  ;;  %2700 = vst [vmem:[%s3636_s13 + $0x178] sm:$0xff] %v2647_v10  ;;  %v2651_v14 = vadd.f32 %v2650_v19, %v3651_v32 }
 0x2f8   : > { %2713 = vst [vmem:[%s3636_s13 + $0x1e0] sm:$0xff] %v2596_v11  ;;  %2715 = vst [vmem:[%s3636_s13 + $0x1f0] sm:$0xff] %v2649_v18 }
 0x2f9   : > { %2714 = vst [vmem:[%s3636_s13 + $0x1e8] sm:$0xff] %v2598_v13  ;;  %2716 = vst [vmem:[%s3636_s13 + $0x1f8] sm:$0xff] %v2651_v14 }
 0x2fa   : > { %3261 = shalt.err (!%p3258_p9)
}
 0x2fb   : > { %s3262_s6 = scalar_lea.hbm %s3761_s12, 8192  ;;  %s3266_s24 = scalar_lea.hbm %s3833_s4, 32768 }
 0x2fc   : > { %p3263_p11 = scmp.ne.s32.totalorder %s3761_s12, %s3262_s6  ;;  %p3267_p4 = scmp.lt.u32.totalorder %s3761_s12, %s3833_s4 }
 0x2fd   : > { %p3268_p3 = scmp.lt.u32.totalorder %s3266_s24, %s3262_s6  ;;  %p3270_p10 = scmp.lt.u32.totalorder %s3262_s6, %s3761_s12 }
 0x2fe   : > { %p3264_p13 = pnand %p3263_p11, %p3846_p12 }
 0x2ff   : > { %p3269_p8 = por %p3268_p3, %p3267_p4 }
 0x300   : > { %p3265_p1 = pneg %p3264_p13 }
 0x301   : > { %p3271_p0 = por %p3270_p10, %p3269_p8 }
 0x303   : > { %p3272_p2 = pnand %p3271_p0, %p3265_p1 }
 0x305   : > { %3275 = shalt.err (!%p3272_p2)
}
 0x306   : > { %s3353_s7 = smov 2048   ;;  %s3354_s8 = smov 4096  }
 0x307   : > { %s3355_s28 = smov 128  }
 0x308   : > { %3131 = dma.vmem_to_hbm [thread:$0]  (%p3846_p12), %s3767_s11, 8192, %s3761_s12, %s3777_s23, %s3353_s7, %s3354_s8, %s3355_s28  }
 0x309 PF: > { %p3143_p5 = scmp.ge.s32.totalorder %s3346_s22, 2  ;;  %s2748_s27 = sand.u32 1, %s3318_s15  }
 0x30a   : > { %p3847_p6 = scmp.ne.s32.totalorder %s3839_s30, 0  ;;  %s2749_s5 = scalar_lea.sflag [#allocation4], %s2748_s27 }
 0x30c   : > { %p3138_p7 = pnand %p3143_p5, %p3847_p6 }
 0x30e   : > { %3313 = dma.done.wait (!%p3138_p7), %s2749_s5, 8192  }
 0x30f   : > { %3315 = vsyncadd (!%p3138_p7), %s2749_s5, 4294959104  ;;  %s18_s22 = sadd.s32 1, %s3346_s22   ;;  %s3848_s15 = smov %s3322_s16 }
 0x310   : > { %p15_p9 = scmp.ge.s32.totalorder %s18_s22, 6   ;;  %s3849_s16 = smov %s3326_s17 }
 0x311   : > { %s3850_s17 = smov %s3460_s9  ;;  %s3851_s18 = smov %s3338_s20 }
 0x312   : > { %s3852_s19 = smov %s3342_s21  ;;  %s3853_s20 = smov %s3856_s25 }
 0x313   : > { %s3854_s21 = smov %s3860_s26  ;;  %17 = sbr.rel (!%p15_p9) target bundleno = 6 (0x6), region = 76 }
 0x31a   :  { %2754 = vsyncpa [#allocation3], 1 }
 0x31b   :  { %2756 = vsyncpa [#allocation3 + $0x1], 1 }
 0x31c   :  { %2757 = vsyncpa [#allocation4], 1 }
 0x31d   :  { %2759 = vsyncpa [#allocation4 + $0x1], 1 }

</bundles_post_ra>
